<compile_context>
chip_gen: v7x
topology: tpu7x:2x2x1
jax: 0.10.0
libtpu: 0.0.40
codegen_flags: <defaults>
</compile_context>

<pallas_src>
import jax
import jax.numpy as jnp
from jax.experimental import pallas as pl
from jax.experimental.pallas import tpu as pltpu

# ----------------------- small, module-consistent sizes ----------------------
EMBED = 32          # embedding_dim
HEADS = 4           # n_heads
LAYERS = 12         # n_layers (ext_layers = [3, 6, 9, 12] needs 12)
FFDIM = 4 * EMBED   # feedforward_dim
PATCH = 4           # patch_size
NPATCH = 4          # num_patches per side  -> 16 patches total
IMG = PATCH * NPATCH
NTOK = NPATCH * NPATCH          # 16 patch tokens
SEQ = NTOK + 1                  # +1 cls token -> 17
S_PAD = 24                      # padded sequence (multiple of 8 sublanes)
EPS_LN = 1e-5                   # TransformerEncoderLayer default layer_norm_eps
EXT_LAYERS = (3, 6, 9, 12)      # 1-based, as in the PyTorch module
EXT_IDX = tuple(l - 1 for l in EXT_LAYERS)   # 0-based grid steps (2, 5, 8, 11)


# --------------------------- in-kernel helpers --------------------------------
def _layernorm(x, g, b, eps):
    mu = jnp.mean(x, axis=-1, keepdims=True)
    xc = x - mu
    var = jnp.mean(xc * xc, axis=-1, keepdims=True)
    return xc * jax.lax.rsqrt(var + eps) * g + b


def _gelu_exact(x):
    # F.gelu default = exact erf gelu
    return 0.5 * x * (1.0 + jax.lax.erf(x * 0.7071067811865476))


# --------------------------- fused Pallas kernel -------------------------------
def fused_encoder_kernel(patches_ref, proj_w_ref, proj_b_ref, pos_ref, cls_ref,
                         ln1_g_ref, ln1_b_ref,
                         wqkv_ref, bqkv_ref, wo_ref, bo_ref,
                         ln2_g_ref, ln2_b_ref,
                         w1_ref, b1_ref, w2_ref, b2_ref,
                         out_ref, x_ref):
    l = pl.program_id(0)
    B, s_pad, D = x_ref.shape
    N = pos_ref.shape[0]
    S = N + 1
    BS = B * s_pad
    HD = D // HEADS
    scale = 1.0 / (HD ** 0.5)

    # ---- step 0: build initial tokens:  [cls | patch_proj + pos | zero pad] ----
    @pl.when(l == 0)
    def _init():
        x_ref[...] = jnp.zeros((B, s_pad, D), jnp.float32)
        proj = jnp.dot(patches_ref[...], proj_w_ref[...],
                       preferred_element_type=jnp.float32) + proj_b_ref[...]
        for b in range(B):                                   # static, tiny B
            x_ref[b, 0:1, :] = cls_ref[...]
            x_ref[b, 1:S, :] = proj[b * N:(b + 1) * N, :] + pos_ref[...]

    # ---- one pre-norm transformer encoder layer on the resident activation ----
    xf = x_ref[...].reshape(BS, D)                           # (B*S_pad, D)

    # self-attention block (norm_first=True)
    xn = _layernorm(xf, ln1_g_ref[0], ln1_b_ref[0], EPS_LN)
    qkv = jnp.dot(xn, wqkv_ref[0],
                  preferred_element_type=jnp.float32) + bqkv_ref[0]   # (BS, 3D)
    qkv3 = qkv.reshape(B, s_pad, 3 * D)
    q = qkv3[:, :, 0 * D:1 * D]
    k = qkv3[:, :, 1 * D:2 * D]
    v = qkv3[:, :, 2 * D:3 * D]

    # mask padded key columns (tokens >= S are padding)
    key_valid = jax.lax.broadcasted_iota(jnp.int32, (B, s_pad, s_pad), 2) < S

    wo = wo_ref[0]                                           # (D, D)
    attn = jnp.zeros((BS, D), jnp.float32)
    for h in range(HEADS):                                   # static unroll
        qh = q[:, :, h * HD:(h + 1) * HD]
        kh = k[:, :, h * HD:(h + 1) * HD]
        vh = v[:, :, h * HD:(h + 1) * HD]
        s = jnp.einsum("bqd,bkd->bqk", qh, kh,
                       preferred_element_type=jnp.float32) * scale
        s = jnp.where(key_valid, s, jnp.float32(-1e30))
        m = jnp.max(s, axis=-1, keepdims=True)
        p = jnp.exp(s - m)
        denom = jnp.sum(p, axis=-1, keepdims=True)
        p = p * pl.reciprocal(denom, approx=True)
        ctx = jnp.einsum("bqk,bkd->bqd", p, vh,
                         preferred_element_type=jnp.float32)          # (B,S_pad,HD)
        # fold the output projection into the head loop -> no concatenate
        attn = attn + jnp.dot(ctx.reshape(BS, HD), wo[h * HD:(h + 1) * HD, :],
                              preferred_element_type=jnp.float32)
    attn = attn + bo_ref[0]
    x1 = xf + attn

    # feed-forward block (norm_first=True)
    xn2 = _layernorm(x1, ln2_g_ref[0], ln2_b_ref[0], EPS_LN)
    h1 = jnp.dot(xn2, w1_ref[0], preferred_element_type=jnp.float32) + b1_ref[0]
    h1 = _gelu_exact(h1)
    h2 = jnp.dot(h1, w2_ref[0], preferred_element_type=jnp.float32) + b2_ref[0]
    x_new = x1 + h2                                          # (BS, D)

    x3 = x_new.reshape(B, s_pad, D)
    x_ref[...] = x3                                          # carry to next layer

    # pack the 4 extraction points into a lane-dense (B, S_pad, 4*D) output
    for slot, lyr in enumerate(EXT_IDX):
        @pl.when(l == lyr)
        def _store(slot=slot):
            out_ref[:, :, slot * D:(slot + 1) * D] = x3


# --------------------------- wrapper --------------------------------------------
def unetr_encoder_forward(images, params):
    B = images.shape[0]
    patches = patchify(images, PATCH)                        # (B, N, P)
    N, P = patches.shape[1], patches.shape[2]
    D = EMBED
    patches_flat = patches.reshape(B * N, P)

    const2 = lambda l: (0, 0)
    layer3 = lambda l: (l, 0, 0)

    in_specs = [
        pl.BlockSpec((B * N, P), const2),        # patches (resident, fetched once)
        pl.BlockSpec((P, D), const2),            # proj_w
        pl.BlockSpec((1, D), const2),            # proj_b
        pl.BlockSpec((N, D), const2),            # pos
        pl.BlockSpec((1, D), const2),            # cls
        # per-layer stacked params, streamed (double-buffered) over the grid
        pl.BlockSpec((1, 1, D), layer3),         # ln1_g
        pl.BlockSpec((1, 1, D), layer3),         # ln1_b
        pl.BlockSpec((1, D, 3 * D), layer3),     # w_qkv
        pl.BlockSpec((1, 1, 3 * D), layer3),     # b_qkv
        pl.BlockSpec((1, D, D), layer3),         # w_out
        pl.BlockSpec((1, 1, D), layer3),         # b_out
        pl.BlockSpec((1, 1, D), layer3),         # ln2_g
        pl.BlockSpec((1, 1, D), layer3),         # ln2_b
        pl.BlockSpec((1, D, FFDIM), layer3),     # w1
        pl.BlockSpec((1, 1, FFDIM), layer3),     # b1
        pl.BlockSpec((1, FFDIM, D), layer3),     # w2
        pl.BlockSpec((1, 1, D), layer3),         # b2
    ]

    packed = pl.pallas_call(
        fused_encoder_kernel,
        out_shape=jax.ShapeDtypeStruct((B, S_PAD, 4 * D), jnp.float32),
        grid=(LAYERS,),
        in_specs=in_specs,
        out_specs=pl.BlockSpec((B, S_PAD, 4 * D), lambda l: (0, 0, 0)),
        scratch_shapes=[pltpu.VMEM((B, S_PAD, D), jnp.float32)],
        compiler_params=pltpu.CompilerParams(dimension_semantics=("arbitrary",)),
    )(patches_flat, params["proj_w"], params["proj_b"], params["pos"],
      params["cls"],
      params["ln1_g"], params["ln1_b"], params["w_qkv"], params["b_qkv"],
      params["w_out"], params["b_out"], params["ln2_g"], params["ln2_b"],
      params["w1"], params["b1"], params["w2"], params["b2"])

    # unpad sequence and split the 4 extraction slots
    return [packed[:, :SEQ, i * D:(i + 1) * D] for i in range(4)]


# --------------------------- glue (plain JAX) ------------------------------------
def patchify(imgs, p):
    B, C, H, W = imgs.shape
    h, w = H // p, W // p
    x = imgs.reshape(B, C, h, p, w, p)
    x = jnp.transpose(x, (0, 2, 4, 3, 5, 1))        # (B, h, w, p, p, C)
    return x.reshape(B, h * w, p * p * C)


# --------------------------- pure-JAX reference (for self-check) -----------------
def _ref_forward(images, params):
    patches = patchify(images, PATCH)
    x = patches @ params["proj_w"] + params["proj_b"] + params["pos"]
    B = x.shape[0]
    cls = jnp.broadcast_to(params["cls"][None], (B, 1, EMBED))
    x = jnp.concatenate([cls, x], axis=1)

    def ln(y, g, b):
        mu = y.mean(-1, keepdims=True)
        var = ((y - mu) ** 2).mean(-1, keepdims=True)
        return (y - mu) * jax.lax.rsqrt(var + EPS_LN) * g + b

    outs = []
    hd = EMBED // HEADS
    for i in range(LAYERS):
        xn = ln(x, params["ln1_g"][i], params["ln1_b"][i])
        qkv = xn @ params["w_qkv"][i] + params["b_qkv"][i]
        q, k, v = jnp.split(qkv, 3, axis=-1)
        B_, S, _ = q.shape
        q = q.reshape(B_, S, HEADS, hd).transpose(0, 2, 1, 3)
        k = k.reshape(B_, S, HEADS, hd).transpose(0, 2, 1, 3)
        v = v.reshape(B_, S, HEADS, hd).transpose(0, 2, 1, 3)
        s = jnp.einsum("bhqd,bhkd->bhqk", q, k) / jnp.sqrt(jnp.float32(hd))
        a = jax.nn.softmax(s, axis=-1)
        o = jnp.einsum("bhqk,bhkd->bhqd", a, v).transpose(0, 2, 1, 3)
        o = o.reshape(B_, S, EMBED) @ params["w_out"][i] + params["b_out"][i]
        x = x + o
        xn2 = ln(x, params["ln2_g"][i], params["ln2_b"][i])
        h = jax.nn.gelu(xn2 @ params["w1"][i] + params["b1"][i], approximate=False)
        x = x + (h @ params["w2"][i] + params["b2"][i])
        if i + 1 in EXT_LAYERS:
            outs.append(x)
    return outs


# --------------------------- parameter init --------------------------------------
def init_params(key):
    P = PATCH * PATCH * 3
    ks = jax.random.split(key, 7)
    return {
        "proj_w": jax.random.normal(ks[0], (P, EMBED), jnp.float32) * 0.02,
        "proj_b": jnp.zeros((1, EMBED), jnp.float32),
        "pos": jax.random.normal(ks[1], (NTOK, EMBED), jnp.float32) * 0.02,
        "cls": jax.random.normal(ks[2], (1, EMBED), jnp.float32) * 0.02,
        # per-layer weights stacked along a leading LAYERS dim
        "ln1_g": jnp.ones((LAYERS, 1, EMBED), jnp.float32),
        "ln1_b": jnp.zeros((LAYERS, 1, EMBED), jnp.float32),
        "w_qkv": jax.random.normal(ks[3], (LAYERS, EMBED, 3 * EMBED), jnp.float32) * 0.02,
        "b_qkv": jnp.zeros((LAYERS, 1, 3 * EMBED), jnp.float32),
        "w_out": jax.random.normal(ks[4], (LAYERS, EMBED, EMBED), jnp.float32) * 0.02,
        "b_out": jnp.zeros((LAYERS, 1, EMBED), jnp.float32),
        "ln2_g": jnp.ones((LAYERS, 1, EMBED), jnp.float32),
        "ln2_b": jnp.zeros((LAYERS, 1, EMBED), jnp.float32),
        "w1": jax.random.normal(ks[5], (LAYERS, EMBED, FFDIM), jnp.float32) * 0.02,
        "b1": jnp.zeros((LAYERS, 1, FFDIM), jnp.float32),
        "w2": jax.random.normal(ks[6], (LAYERS, FFDIM, EMBED), jnp.float32) * 0.02,
        "b2": jnp.zeros((LAYERS, 1, EMBED), jnp.float32),
    }


# --------------------------- main --------------------------------------------------
if __name__ == "__main__":
    key = jax.random.PRNGKey(0)
    k_img, k_par = jax.random.split(key)
    images = jax.random.normal(k_img, (2, 3, IMG, IMG), jnp.float32)
    params = init_params(k_par)

    fwd = jax.jit(unetr_encoder_forward)
    outs = fwd(images, params)
    outs = [jax.block_until_ready(o) for o in outs]

    # sanity: shapes and numerical agreement with a pure-JAX reference
    refs = _ref_forward(images, params)
    assert len(outs) == 4
    for o, r in zip(outs, refs):
        assert o.shape == (2, SEQ, EMBED)
        err = float(jnp.max(jnp.abs(o - r)))
        assert jnp.allclose(o, r, atol=2e-3, rtol=2e-3), f"max abs err {err}"

    print("KERNEL_OK")
</pallas_src>

<mosaic_0001>
module attributes {stable_mosaic.version = 11 : i64} {
  func.func @fused_encoder_kernel(%arg0: i32, %arg1: memref<32x48xf32, #tpu.memory_space<vmem>>, %arg2: memref<48x32xf32, #tpu.memory_space<vmem>>, %arg3: memref<1x32xf32, #tpu.memory_space<vmem>>, %arg4: memref<16x32xf32, #tpu.memory_space<vmem>>, %arg5: memref<1x32xf32, #tpu.memory_space<vmem>>, %arg6: memref<1x1x32xf32, #tpu.memory_space<vmem>>, %arg7: memref<1x1x32xf32, #tpu.memory_space<vmem>>, %arg8: memref<1x32x96xf32, #tpu.memory_space<vmem>>, %arg9: memref<1x1x96xf32, #tpu.memory_space<vmem>>, %arg10: memref<1x32x32xf32, #tpu.memory_space<vmem>>, %arg11: memref<1x1x32xf32, #tpu.memory_space<vmem>>, %arg12: memref<1x1x32xf32, #tpu.memory_space<vmem>>, %arg13: memref<1x1x32xf32, #tpu.memory_space<vmem>>, %arg14: memref<1x32x128xf32, #tpu.memory_space<vmem>>, %arg15: memref<1x1x128xf32, #tpu.memory_space<vmem>>, %arg16: memref<1x128x32xf32, #tpu.memory_space<vmem>>, %arg17: memref<1x1x32xf32, #tpu.memory_space<vmem>>, %arg18: memref<2x24x128xf32, #tpu.memory_space<vmem>>, %arg19: memref<2x24x32xf32, #tpu.memory_space<vmem>>) attributes {dimension_semantics = [#tpu.dimension_semantics<arbitrary>], iteration_bounds = array<i64: 12>, scalar_prefetch = 0 : i64, scratch_operands = 1 : i64, tpu.core_type = #tpu.core_type<tc>, window_params = [{pipeline_mode = #tpu.pipeline_mode<synchronous>, transform_indices = @transform_0, window_bounds = array<i64: 32, 48>}, {pipeline_mode = #tpu.pipeline_mode<synchronous>, transform_indices = @transform_1, window_bounds = array<i64: 48, 32>}, {pipeline_mode = #tpu.pipeline_mode<synchronous>, transform_indices = @transform_2, window_bounds = array<i64: 1, 32>}, {pipeline_mode = #tpu.pipeline_mode<synchronous>, transform_indices = @transform_3, window_bounds = array<i64: 16, 32>}, {pipeline_mode = #tpu.pipeline_mode<synchronous>, transform_indices = @transform_4, window_bounds = array<i64: 1, 32>}, {transform_indices = @transform_5, window_bounds = array<i64: 1, 1, 32>}, {transform_indices = @transform_6, window_bounds = array<i64: 1, 1, 32>}, {transform_indices = @transform_7, window_bounds = array<i64: 1, 32, 96>}, {transform_indices = @transform_8, window_bounds = array<i64: 1, 1, 96>}, {transform_indices = @transform_9, window_bounds = array<i64: 1, 32, 32>}, {transform_indices = @transform_10, window_bounds = array<i64: 1, 1, 32>}, {transform_indices = @transform_11, window_bounds = array<i64: 1, 1, 32>}, {transform_indices = @transform_12, window_bounds = array<i64: 1, 1, 32>}, {transform_indices = @transform_13, window_bounds = array<i64: 1, 32, 128>}, {transform_indices = @transform_14, window_bounds = array<i64: 1, 1, 128>}, {transform_indices = @transform_15, window_bounds = array<i64: 1, 128, 32>}, {transform_indices = @transform_16, window_bounds = array<i64: 1, 1, 32>}, {pipeline_mode = #tpu.pipeline_mode<synchronous>, transform_indices = @transform_17, window_bounds = array<i64: 2, 24, 128>}]} {
    %c0_i32 = arith.constant 0 : i32
    %0 = arith.cmpi eq, %arg0, %c0_i32 : i32
    %1 = arith.extui %0 : i1 to i32
    %c0_i32_0 = arith.constant 0 : i32
    %2 = arith.cmpi ne, %1, %c0_i32_0 : i32
    scf.if %2 {
      %cst_90 = arith.constant 0.000000e+00 : f32
      %204 = vector.broadcast %cst_90 : f32 to vector<2x24x32xf32>
      %c0_91 = arith.constant 0 : index
      %c0_92 = arith.constant 0 : index
      %c0_93 = arith.constant 0 : index
      %205 = vector.load %arg19[%c0_91, %c0_92, %c0_93] : memref<2x24x32xf32, #tpu.memory_space<vmem>>, vector<2x24x32xf32>
      tpu.vector_store %arg19[%c0_91, %c0_92, %c0_93], %204 {strides = array<i32>} : memref<2x24x32xf32, #tpu.memory_space<vmem>>, vector<2x24x32xf32>,
      %c0_94 = arith.constant 0 : index
      %c0_95 = arith.constant 0 : index
      %206 = vector.load %arg1[%c0_94, %c0_95] : memref<32x48xf32, #tpu.memory_space<vmem>>, vector<32x48xf32>
      %c0_96 = arith.constant 0 : index
      %c0_97 = arith.constant 0 : index
      %207 = vector.load %arg2[%c0_96, %c0_97] : memref<48x32xf32, #tpu.memory_space<vmem>>, vector<48x32xf32>
      %cst_98 = arith.constant dense<0.000000e+00> : vector<32x32xf32>
      %208 = tpu.matmul %206, %207, %cst_98 {dimension_numbers = #tpu.dot_dimension_numbers<[1], [0], [0], [1], [0, 0, 1, 1], [], []>} : vector<32x48xf32>, vector<48x32xf32>, vector<32x32xf32> -> vector<32x32xf32>
      %c0_99 = arith.constant 0 : index
      %c0_100 = arith.constant 0 : index
      %209 = vector.load %arg3[%c0_99, %c0_100] : memref<1x32xf32, #tpu.memory_space<vmem>>, vector<1x32xf32>
      %210 = vector.broadcast %209 : vector<1x32xf32> to vector<32x32xf32>
      %211 = arith.addf %208, %210 : vector<32x32xf32>
      %c0_101 = arith.constant 0 : index
      %c0_102 = arith.constant 0 : index
      %212 = vector.load %arg5[%c0_101, %c0_102] : memref<1x32xf32, #tpu.memory_space<vmem>>, vector<1x32xf32>
      %c0_103 = arith.constant 0 : index
      %c0_104 = arith.constant 0 : index
      %c0_105 = arith.constant 0 : index
      %213 = vector.load %arg19[%c0_103, %c0_104, %c0_105] : memref<2x24x32xf32, #tpu.memory_space<vmem>>, vector<1x1x32xf32>
      %214 = vector.shape_cast %213 : vector<1x1x32xf32> to vector<1x32xf32>
      %215 = vector.shape_cast %212 : vector<1x32xf32> to vector<1x1x32xf32>
      tpu.vector_store %arg19[%c0_103, %c0_104, %c0_105], %215 {strides = array<i32>} : memref<2x24x32xf32, #tpu.memory_space<vmem>>, vector<1x1x32xf32>,
      %216 = vector.extract_strided_slice %211 {offsets = [0, 0], sizes = [16, 32], strides = [1, 1]} : vector<32x32xf32> to vector<16x32xf32>
      %c0_106 = arith.constant 0 : index
      %c0_107 = arith.constant 0 : index
      %217 = vector.load %arg4[%c0_106, %c0_107] : memref<16x32xf32, #tpu.memory_space<vmem>>, vector<16x32xf32>
      %218 = arith.addf %216, %217 : vector<16x32xf32>
      %c0_108 = arith.constant 0 : index
      %c1 = arith.constant 1 : index
      %c0_109 = arith.constant 0 : index
      %219 = vector.load %arg19[%c0_108, %c1, %c0_109] : memref<2x24x32xf32, #tpu.memory_space<vmem>>, vector<1x16x32xf32>
      %220 = vector.shape_cast %219 : vector<1x16x32xf32> to vector<16x32xf32>
      %221 = vector.shape_cast %218 : vector<16x32xf32> to vector<1x16x32xf32>
      tpu.vector_store %arg19[%c0_108, %c1, %c0_109], %221 {strides = array<i32>} : memref<2x24x32xf32, #tpu.memory_space<vmem>>, vector<1x16x32xf32>,
      %c0_110 = arith.constant 0 : index
      %c0_111 = arith.constant 0 : index
      %222 = vector.load %arg5[%c0_110, %c0_111] : memref<1x32xf32, #tpu.memory_space<vmem>>, vector<1x32xf32>
      %c1_112 = arith.constant 1 : index
      %c0_113 = arith.constant 0 : index
      %c0_114 = arith.constant 0 : index
      %223 = vector.load %arg19[%c1_112, %c0_113, %c0_114] : memref<2x24x32xf32, #tpu.memory_space<vmem>>, vector<1x1x32xf32>
      %224 = vector.shape_cast %223 : vector<1x1x32xf32> to vector<1x32xf32>
      %225 = vector.shape_cast %222 : vector<1x32xf32> to vector<1x1x32xf32>
      tpu.vector_store %arg19[%c1_112, %c0_113, %c0_114], %225 {strides = array<i32>} : memref<2x24x32xf32, #tpu.memory_space<vmem>>, vector<1x1x32xf32>,
      %226 = vector.extract_strided_slice %211 {offsets = [16, 0], sizes = [16, 32], strides = [1, 1]} : vector<32x32xf32> to vector<16x32xf32>
      %c0_115 = arith.constant 0 : index
      %c0_116 = arith.constant 0 : index
      %227 = vector.load %arg4[%c0_115, %c0_116] : memref<16x32xf32, #tpu.memory_space<vmem>>, vector<16x32xf32>
      %228 = arith.addf %226, %227 : vector<16x32xf32>
      %c1_117 = arith.constant 1 : index
      %c1_118 = arith.constant 1 : index
      %c0_119 = arith.constant 0 : index
      %229 = vector.load %arg19[%c1_117, %c1_118, %c0_119] : memref<2x24x32xf32, #tpu.memory_space<vmem>>, vector<1x16x32xf32>
      %230 = vector.shape_cast %229 : vector<1x16x32xf32> to vector<16x32xf32>
      %231 = vector.shape_cast %228 : vector<16x32xf32> to vector<1x16x32xf32>
      tpu.vector_store %arg19[%c1_117, %c1_118, %c0_119], %231 {strides = array<i32>} : memref<2x24x32xf32, #tpu.memory_space<vmem>>, vector<1x16x32xf32>,
    } else {
    }
    %c0 = arith.constant 0 : index
    %c0_1 = arith.constant 0 : index
    %c0_2 = arith.constant 0 : index
    %3 = vector.load %arg19[%c0, %c0_1, %c0_2] : memref<2x24x32xf32, #tpu.memory_space<vmem>>, vector<2x24x32xf32>
    %4 = vector.shape_cast %3 : vector<2x24x32xf32> to vector<48x32xf32>
    %c0_3 = arith.constant 0 : index
    %c0_4 = arith.constant 0 : index
    %c0_5 = arith.constant 0 : index
    %5 = vector.load %arg6[%c0_3, %c0_4, %c0_5] : memref<1x1x32xf32, #tpu.memory_space<vmem>>, vector<1x1x32xf32>
    %6 = vector.shape_cast %5 : vector<1x1x32xf32> to vector<1x32xf32>
    %c0_6 = arith.constant 0 : index
    %c0_7 = arith.constant 0 : index
    %c0_8 = arith.constant 0 : index
    %7 = vector.load %arg7[%c0_6, %c0_7, %c0_8] : memref<1x1x32xf32, #tpu.memory_space<vmem>>, vector<1x1x32xf32>
    %8 = vector.shape_cast %7 : vector<1x1x32xf32> to vector<1x32xf32>
    %cst = arith.constant dense<0.000000e+00> : vector<48xf32>
    %9 = vector.multi_reduction <add>, %4, %cst [1] : vector<48x32xf32> to vector<48xf32>
    %10 = vector.shape_cast %9 : vector<48xf32> to vector<48x1xf32>
    %cst_9 = arith.constant 3.200000e+01 : f32
    %11 = vector.broadcast %cst_9 : f32 to vector<48x1xf32>
    %12 = arith.divf %10, %11 : vector<48x1xf32>
    %13 = vector.broadcast %12 : vector<48x1xf32> to vector<48x32xf32>
    %14 = arith.subf %4, %13 : vector<48x32xf32>
    %15 = arith.mulf %14, %14 : vector<48x32xf32>
    %cst_10 = arith.constant dense<0.000000e+00> : vector<48xf32>
    %16 = vector.multi_reduction <add>, %15, %cst_10 [1] : vector<48x32xf32> to vector<48xf32>
    %17 = vector.shape_cast %16 : vector<48xf32> to vector<48x1xf32>
    %cst_11 = arith.constant 3.200000e+01 : f32
    %18 = vector.broadcast %cst_11 : f32 to vector<48x1xf32>
    %19 = arith.divf %17, %18 : vector<48x1xf32>
    %cst_12 = arith.constant 9.99999974E-6 : f32
    %20 = vector.broadcast %cst_12 : f32 to vector<48x1xf32>
    %21 = arith.addf %19, %20 : vector<48x1xf32>
    %22 = math.rsqrt %21 : vector<48x1xf32>
    %23 = vector.broadcast %22 : vector<48x1xf32> to vector<48x32xf32>
    %24 = arith.mulf %14, %23 : vector<48x32xf32>
    %25 = vector.broadcast %6 : vector<1x32xf32> to vector<48x32xf32>
    %26 = arith.mulf %24, %25 : vector<48x32xf32>
    %27 = vector.broadcast %8 : vector<1x32xf32> to vector<48x32xf32>
    %28 = arith.addf %26, %27 : vector<48x32xf32>
    %c0_13 = arith.constant 0 : index
    %c0_14 = arith.constant 0 : index
    %c0_15 = arith.constant 0 : index
    %29 = vector.load %arg8[%c0_13, %c0_14, %c0_15] : memref<1x32x96xf32, #tpu.memory_space<vmem>>, vector<1x32x96xf32>
    %30 = vector.shape_cast %29 : vector<1x32x96xf32> to vector<32x96xf32>
    %cst_16 = arith.constant dense<0.000000e+00> : vector<48x96xf32>
    %31 = tpu.matmul %28, %30, %cst_16 {dimension_numbers = #tpu.dot_dimension_numbers<[1], [0], [0], [1], [0, 0, 1, 1], [], []>} : vector<48x32xf32>, vector<32x96xf32>, vector<48x96xf32> -> vector<48x96xf32>
    %c0_17 = arith.constant 0 : index
    %c0_18 = arith.constant 0 : index
    %c0_19 = arith.constant 0 : index
    %32 = vector.load %arg9[%c0_17, %c0_18, %c0_19] : memref<1x1x96xf32, #tpu.memory_space<vmem>>, vector<1x1x96xf32>
    %33 = vector.shape_cast %32 : vector<1x1x96xf32> to vector<1x96xf32>
    %34 = vector.broadcast %33 : vector<1x96xf32> to vector<48x96xf32>
    %35 = arith.addf %31, %34 : vector<48x96xf32>
    %36 = vector.shape_cast %35 : vector<48x96xf32> to vector<2x24x96xf32>
    %37 = vector.extract_strided_slice %36 {offsets = [0, 0, 0], sizes = [2, 24, 32], strides = [1, 1, 1]} : vector<2x24x96xf32> to vector<2x24x32xf32>
    %38 = vector.extract_strided_slice %36 {offsets = [0, 0, 32], sizes = [2, 24, 32], strides = [1, 1, 1]} : vector<2x24x96xf32> to vector<2x24x32xf32>
    %39 = vector.extract_strided_slice %36 {offsets = [0, 0, 64], sizes = [2, 24, 32], strides = [1, 1, 1]} : vector<2x24x96xf32> to vector<2x24x32xf32>
    %40 = tpu.iota {dimensions = array<i32: 2>} : vector<2x24x24xi32>
    %c17_i32 = arith.constant 17 : i32
    %41 = vector.broadcast %c17_i32 : i32 to vector<2x24x24xi32>
    %42 = arith.cmpi slt, %40, %41 : vector<2x24x24xi32>
    %c0_20 = arith.constant 0 : index
    %c0_21 = arith.constant 0 : index
    %c0_22 = arith.constant 0 : index
    %43 = vector.load %arg10[%c0_20, %c0_21, %c0_22] : memref<1x32x32xf32, #tpu.memory_space<vmem>>, vector<1x32x32xf32>
    %44 = vector.shape_cast %43 : vector<1x32x32xf32> to vector<32x32xf32>
    %cst_23 = arith.constant 0.000000e+00 : f32
    %45 = vector.broadcast %cst_23 : f32 to vector<48x32xf32>
    %46 = vector.extract_strided_slice %37 {offsets = [0, 0, 0], sizes = [2, 24, 8], strides = [1, 1, 1]} : vector<2x24x32xf32> to vector<2x24x8xf32>
    %47 = vector.extract_strided_slice %38 {offsets = [0, 0, 0], sizes = [2, 24, 8], strides = [1, 1, 1]} : vector<2x24x32xf32> to vector<2x24x8xf32>
    %48 = vector.extract_strided_slice %39 {offsets = [0, 0, 0], sizes = [2, 24, 8], strides = [1, 1, 1]} : vector<2x24x32xf32> to vector<2x24x8xf32>
    "tpu.trace_start"() <{level = 10 : i32, message = "bqd,bkd->bqk"}> : () -> ()
    %cst_24 = arith.constant dense<0.000000e+00> : vector<2x24x24xf32>
    %49 = tpu.matmul %46, %47, %cst_24 {dimension_numbers = #tpu.dot_dimension_numbers<[2], [2], [1], [1], [0, 0, 0, 1, 1, 1], [0], [0]>} : vector<2x24x8xf32>, vector<2x24x8xf32>, vector<2x24x24xf32> -> vector<2x24x24xf32>
    "tpu.trace_stop"() : () -> ()
    %cst_25 = arith.constant 0.353553385 : f32
    %50 = vector.broadcast %cst_25 : f32 to vector<2x24x24xf32>
    %51 = arith.mulf %49, %50 : vector<2x24x24xf32>
    %cst_26 = arith.constant -1.000000e+30 : f32
    %52 = vector.broadcast %cst_26 : f32 to vector<2x24x24xf32>
    %53 = arith.select %42, %51, %52 : vector<2x24x24xi1>, vector<2x24x24xf32>
    %cst_27 = arith.constant dense<0xFF800000> : vector<2x24xf32>
    %54 = vector.multi_reduction <maximumf>, %53, %cst_27 [2] : vector<2x24x24xf32> to vector<2x24xf32>
    %55 = vector.shape_cast %54 : vector<2x24xf32> to vector<2x24x1xf32>
    %56 = vector.broadcast %55 : vector<2x24x1xf32> to vector<2x24x24xf32>
    %57 = arith.subf %53, %56 : vector<2x24x24xf32>
    %58 = math.exp %57 : vector<2x24x24xf32>
    %cst_28 = arith.constant dense<0.000000e+00> : vector<2x24xf32>
    %59 = vector.multi_reduction <add>, %58, %cst_28 [2] : vector<2x24x24xf32> to vector<2x24xf32>
    %60 = vector.shape_cast %59 : vector<2x24xf32> to vector<2x24x1xf32>
    %61 = tpu.reciprocal %60 {approx = true} : vector<2x24x1xf32> -> vector<2x24x1xf32>
    %62 = vector.broadcast %61 : vector<2x24x1xf32> to vector<2x24x24xf32>
    %63 = arith.mulf %58, %62 : vector<2x24x24xf32>
    "tpu.trace_start"() <{level = 10 : i32, message = "bqk,bkd->bqd"}> : () -> ()
    %cst_29 = arith.constant dense<0.000000e+00> : vector<2x24x8xf32>
    %64 = tpu.matmul %63, %48, %cst_29 {dimension_numbers = #tpu.dot_dimension_numbers<[2], [1], [1], [2], [0, 0, 0, 1, 1, 2], [0], [0]>} : vector<2x24x24xf32>, vector<2x24x8xf32>, vector<2x24x8xf32> -> vector<2x24x8xf32>
    "tpu.trace_stop"() : () -> ()
    %65 = vector.shape_cast %64 : vector<2x24x8xf32> to vector<48x8xf32>
    %66 = vector.extract_strided_slice %44 {offsets = [0, 0], sizes = [8, 32], strides = [1, 1]} : vector<32x32xf32> to vector<8x32xf32>
    %cst_30 = arith.constant dense<0.000000e+00> : vector<48x32xf32>
    %67 = tpu.matmul %65, %66, %cst_30 {dimension_numbers = #tpu.dot_dimension_numbers<[1], [0], [0], [1], [0, 0, 1, 1], [], []>} : vector<48x8xf32>, vector<8x32xf32>, vector<48x32xf32> -> vector<48x32xf32>
    %68 = arith.addf %45, %67 : vector<48x32xf32>
    %69 = vector.extract_strided_slice %37 {offsets = [0, 0, 8], sizes = [2, 24, 8], strides = [1, 1, 1]} : vector<2x24x32xf32> to vector<2x24x8xf32>
    %70 = vector.extract_strided_slice %38 {offsets = [0, 0, 8], sizes = [2, 24, 8], strides = [1, 1, 1]} : vector<2x24x32xf32> to vector<2x24x8xf32>
    %71 = vector.extract_strided_slice %39 {offsets = [0, 0, 8], sizes = [2, 24, 8], strides = [1, 1, 1]} : vector<2x24x32xf32> to vector<2x24x8xf32>
    "tpu.trace_start"() <{level = 10 : i32, message = "bqd,bkd->bqk"}> : () -> ()
    %cst_31 = arith.constant dense<0.000000e+00> : vector<2x24x24xf32>
    %72 = tpu.matmul %69, %70, %cst_31 {dimension_numbers = #tpu.dot_dimension_numbers<[2], [2], [1], [1], [0, 0, 0, 1, 1, 1], [0], [0]>} : vector<2x24x8xf32>, vector<2x24x8xf32>, vector<2x24x24xf32> -> vector<2x24x24xf32>
    "tpu.trace_stop"() : () -> ()
    %cst_32 = arith.constant 0.353553385 : f32
    %73 = vector.broadcast %cst_32 : f32 to vector<2x24x24xf32>
    %74 = arith.mulf %72, %73 : vector<2x24x24xf32>
    %cst_33 = arith.constant -1.000000e+30 : f32
    %75 = vector.broadcast %cst_33 : f32 to vector<2x24x24xf32>
    %76 = arith.select %42, %74, %75 : vector<2x24x24xi1>, vector<2x24x24xf32>
    %cst_34 = arith.constant dense<0xFF800000> : vector<2x24xf32>
    %77 = vector.multi_reduction <maximumf>, %76, %cst_34 [2] : vector<2x24x24xf32> to vector<2x24xf32>
    %78 = vector.shape_cast %77 : vector<2x24xf32> to vector<2x24x1xf32>
    %79 = vector.broadcast %78 : vector<2x24x1xf32> to vector<2x24x24xf32>
    %80 = arith.subf %76, %79 : vector<2x24x24xf32>
    %81 = math.exp %80 : vector<2x24x24xf32>
    %cst_35 = arith.constant dense<0.000000e+00> : vector<2x24xf32>
    %82 = vector.multi_reduction <add>, %81, %cst_35 [2] : vector<2x24x24xf32> to vector<2x24xf32>
    %83 = vector.shape_cast %82 : vector<2x24xf32> to vector<2x24x1xf32>
    %84 = tpu.reciprocal %83 {approx = true} : vector<2x24x1xf32> -> vector<2x24x1xf32>
    %85 = vector.broadcast %84 : vector<2x24x1xf32> to vector<2x24x24xf32>
    %86 = arith.mulf %81, %85 : vector<2x24x24xf32>
    "tpu.trace_start"() <{level = 10 : i32, message = "bqk,bkd->bqd"}> : () -> ()
    %cst_36 = arith.constant dense<0.000000e+00> : vector<2x24x8xf32>
    %87 = tpu.matmul %86, %71, %cst_36 {dimension_numbers = #tpu.dot_dimension_numbers<[2], [1], [1], [2], [0, 0, 0, 1, 1, 2], [0], [0]>} : vector<2x24x24xf32>, vector<2x24x8xf32>, vector<2x24x8xf32> -> vector<2x24x8xf32>
    "tpu.trace_stop"() : () -> ()
    %88 = vector.shape_cast %87 : vector<2x24x8xf32> to vector<48x8xf32>
    %89 = vector.extract_strided_slice %44 {offsets = [8, 0], sizes = [8, 32], strides = [1, 1]} : vector<32x32xf32> to vector<8x32xf32>
    %cst_37 = arith.constant dense<0.000000e+00> : vector<48x32xf32>
    %90 = tpu.matmul %88, %89, %cst_37 {dimension_numbers = #tpu.dot_dimension_numbers<[1], [0], [0], [1], [0, 0, 1, 1], [], []>} : vector<48x8xf32>, vector<8x32xf32>, vector<48x32xf32> -> vector<48x32xf32>
    %91 = arith.addf %68, %90 : vector<48x32xf32>
    %92 = vector.extract_strided_slice %37 {offsets = [0, 0, 16], sizes = [2, 24, 8], strides = [1, 1, 1]} : vector<2x24x32xf32> to vector<2x24x8xf32>
    %93 = vector.extract_strided_slice %38 {offsets = [0, 0, 16], sizes = [2, 24, 8], strides = [1, 1, 1]} : vector<2x24x32xf32> to vector<2x24x8xf32>
    %94 = vector.extract_strided_slice %39 {offsets = [0, 0, 16], sizes = [2, 24, 8], strides = [1, 1, 1]} : vector<2x24x32xf32> to vector<2x24x8xf32>
    "tpu.trace_start"() <{level = 10 : i32, message = "bqd,bkd->bqk"}> : () -> ()
    %cst_38 = arith.constant dense<0.000000e+00> : vector<2x24x24xf32>
    %95 = tpu.matmul %92, %93, %cst_38 {dimension_numbers = #tpu.dot_dimension_numbers<[2], [2], [1], [1], [0, 0, 0, 1, 1, 1], [0], [0]>} : vector<2x24x8xf32>, vector<2x24x8xf32>, vector<2x24x24xf32> -> vector<2x24x24xf32>
    "tpu.trace_stop"() : () -> ()
    %cst_39 = arith.constant 0.353553385 : f32
    %96 = vector.broadcast %cst_39 : f32 to vector<2x24x24xf32>
    %97 = arith.mulf %95, %96 : vector<2x24x24xf32>
    %cst_40 = arith.constant -1.000000e+30 : f32
    %98 = vector.broadcast %cst_40 : f32 to vector<2x24x24xf32>
    %99 = arith.select %42, %97, %98 : vector<2x24x24xi1>, vector<2x24x24xf32>
    %cst_41 = arith.constant dense<0xFF800000> : vector<2x24xf32>
    %100 = vector.multi_reduction <maximumf>, %99, %cst_41 [2] : vector<2x24x24xf32> to vector<2x24xf32>
    %101 = vector.shape_cast %100 : vector<2x24xf32> to vector<2x24x1xf32>
    %102 = vector.broadcast %101 : vector<2x24x1xf32> to vector<2x24x24xf32>
    %103 = arith.subf %99, %102 : vector<2x24x24xf32>
    %104 = math.exp %103 : vector<2x24x24xf32>
    %cst_42 = arith.constant dense<0.000000e+00> : vector<2x24xf32>
    %105 = vector.multi_reduction <add>, %104, %cst_42 [2] : vector<2x24x24xf32> to vector<2x24xf32>
    %106 = vector.shape_cast %105 : vector<2x24xf32> to vector<2x24x1xf32>
    %107 = tpu.reciprocal %106 {approx = true} : vector<2x24x1xf32> -> vector<2x24x1xf32>
    %108 = vector.broadcast %107 : vector<2x24x1xf32> to vector<2x24x24xf32>
    %109 = arith.mulf %104, %108 : vector<2x24x24xf32>
    "tpu.trace_start"() <{level = 10 : i32, message = "bqk,bkd->bqd"}> : () -> ()
    %cst_43 = arith.constant dense<0.000000e+00> : vector<2x24x8xf32>
    %110 = tpu.matmul %109, %94, %cst_43 {dimension_numbers = #tpu.dot_dimension_numbers<[2], [1], [1], [2], [0, 0, 0, 1, 1, 2], [0], [0]>} : vector<2x24x24xf32>, vector<2x24x8xf32>, vector<2x24x8xf32> -> vector<2x24x8xf32>
    "tpu.trace_stop"() : () -> ()
    %111 = vector.shape_cast %110 : vector<2x24x8xf32> to vector<48x8xf32>
    %112 = vector.extract_strided_slice %44 {offsets = [16, 0], sizes = [8, 32], strides = [1, 1]} : vector<32x32xf32> to vector<8x32xf32>
    %cst_44 = arith.constant dense<0.000000e+00> : vector<48x32xf32>
    %113 = tpu.matmul %111, %112, %cst_44 {dimension_numbers = #tpu.dot_dimension_numbers<[1], [0], [0], [1], [0, 0, 1, 1], [], []>} : vector<48x8xf32>, vector<8x32xf32>, vector<48x32xf32> -> vector<48x32xf32>
    %114 = arith.addf %91, %113 : vector<48x32xf32>
    %115 = vector.extract_strided_slice %37 {offsets = [0, 0, 24], sizes = [2, 24, 8], strides = [1, 1, 1]} : vector<2x24x32xf32> to vector<2x24x8xf32>
    %116 = vector.extract_strided_slice %38 {offsets = [0, 0, 24], sizes = [2, 24, 8], strides = [1, 1, 1]} : vector<2x24x32xf32> to vector<2x24x8xf32>
    %117 = vector.extract_strided_slice %39 {offsets = [0, 0, 24], sizes = [2, 24, 8], strides = [1, 1, 1]} : vector<2x24x32xf32> to vector<2x24x8xf32>
    "tpu.trace_start"() <{level = 10 : i32, message = "bqd,bkd->bqk"}> : () -> ()
    %cst_45 = arith.constant dense<0.000000e+00> : vector<2x24x24xf32>
    %118 = tpu.matmul %115, %116, %cst_45 {dimension_numbers = #tpu.dot_dimension_numbers<[2], [2], [1], [1], [0, 0, 0, 1, 1, 1], [0], [0]>} : vector<2x24x8xf32>, vector<2x24x8xf32>, vector<2x24x24xf32> -> vector<2x24x24xf32>
    "tpu.trace_stop"() : () -> ()
    %cst_46 = arith.constant 0.353553385 : f32
    %119 = vector.broadcast %cst_46 : f32 to vector<2x24x24xf32>
    %120 = arith.mulf %118, %119 : vector<2x24x24xf32>
    %cst_47 = arith.constant -1.000000e+30 : f32
    %121 = vector.broadcast %cst_47 : f32 to vector<2x24x24xf32>
    %122 = arith.select %42, %120, %121 : vector<2x24x24xi1>, vector<2x24x24xf32>
    %cst_48 = arith.constant dense<0xFF800000> : vector<2x24xf32>
    %123 = vector.multi_reduction <maximumf>, %122, %cst_48 [2] : vector<2x24x24xf32> to vector<2x24xf32>
    %124 = vector.shape_cast %123 : vector<2x24xf32> to vector<2x24x1xf32>
    %125 = vector.broadcast %124 : vector<2x24x1xf32> to vector<2x24x24xf32>
    %126 = arith.subf %122, %125 : vector<2x24x24xf32>
    %127 = math.exp %126 : vector<2x24x24xf32>
    %cst_49 = arith.constant dense<0.000000e+00> : vector<2x24xf32>
    %128 = vector.multi_reduction <add>, %127, %cst_49 [2] : vector<2x24x24xf32> to vector<2x24xf32>
    %129 = vector.shape_cast %128 : vector<2x24xf32> to vector<2x24x1xf32>
    %130 = tpu.reciprocal %129 {approx = true} : vector<2x24x1xf32> -> vector<2x24x1xf32>
    %131 = vector.broadcast %130 : vector<2x24x1xf32> to vector<2x24x24xf32>
    %132 = arith.mulf %127, %131 : vector<2x24x24xf32>
    "tpu.trace_start"() <{level = 10 : i32, message = "bqk,bkd->bqd"}> : () -> ()
    %cst_50 = arith.constant dense<0.000000e+00> : vector<2x24x8xf32>
    %133 = tpu.matmul %132, %117, %cst_50 {dimension_numbers = #tpu.dot_dimension_numbers<[2], [1], [1], [2], [0, 0, 0, 1, 1, 2], [0], [0]>} : vector<2x24x24xf32>, vector<2x24x8xf32>, vector<2x24x8xf32> -> vector<2x24x8xf32>
    "tpu.trace_stop"() : () -> ()
    %134 = vector.shape_cast %133 : vector<2x24x8xf32> to vector<48x8xf32>
    %135 = vector.extract_strided_slice %44 {offsets = [24, 0], sizes = [8, 32], strides = [1, 1]} : vector<32x32xf32> to vector<8x32xf32>
    %cst_51 = arith.constant dense<0.000000e+00> : vector<48x32xf32>
    %136 = tpu.matmul %134, %135, %cst_51 {dimension_numbers = #tpu.dot_dimension_numbers<[1], [0], [0], [1], [0, 0, 1, 1], [], []>} : vector<48x8xf32>, vector<8x32xf32>, vector<48x32xf32> -> vector<48x32xf32>
    %137 = arith.addf %114, %136 : vector<48x32xf32>
    %c0_52 = arith.constant 0 : index
    %c0_53 = arith.constant 0 : index
    %c0_54 = arith.constant 0 : index
    %138 = vector.load %arg11[%c0_52, %c0_53, %c0_54] : memref<1x1x32xf32, #tpu.memory_space<vmem>>, vector<1x1x32xf32>
    %139 = vector.shape_cast %138 : vector<1x1x32xf32> to vector<1x32xf32>
    %140 = vector.broadcast %139 : vector<1x32xf32> to vector<48x32xf32>
    %141 = arith.addf %137, %140 : vector<48x32xf32>
    %142 = arith.addf %4, %141 : vector<48x32xf32>
    %c0_55 = arith.constant 0 : index
    %c0_56 = arith.constant 0 : index
    %c0_57 = arith.constant 0 : index
    %143 = vector.load %arg12[%c0_55, %c0_56, %c0_57] : memref<1x1x32xf32, #tpu.memory_space<vmem>>, vector<1x1x32xf32>
    %144 = vector.shape_cast %143 : vector<1x1x32xf32> to vector<1x32xf32>
    %c0_58 = arith.constant 0 : index
    %c0_59 = arith.constant 0 : index
    %c0_60 = arith.constant 0 : index
    %145 = vector.load %arg13[%c0_58, %c0_59, %c0_60] : memref<1x1x32xf32, #tpu.memory_space<vmem>>, vector<1x1x32xf32>
    %146 = vector.shape_cast %145 : vector<1x1x32xf32> to vector<1x32xf32>
    %cst_61 = arith.constant dense<0.000000e+00> : vector<48xf32>
    %147 = vector.multi_reduction <add>, %142, %cst_61 [1] : vector<48x32xf32> to vector<48xf32>
    %148 = vector.shape_cast %147 : vector<48xf32> to vector<48x1xf32>
    %cst_62 = arith.constant 3.200000e+01 : f32
    %149 = vector.broadcast %cst_62 : f32 to vector<48x1xf32>
    %150 = arith.divf %148, %149 : vector<48x1xf32>
    %151 = vector.broadcast %150 : vector<48x1xf32> to vector<48x32xf32>
    %152 = arith.subf %142, %151 : vector<48x32xf32>
    %153 = arith.mulf %152, %152 : vector<48x32xf32>
    %cst_63 = arith.constant dense<0.000000e+00> : vector<48xf32>
    %154 = vector.multi_reduction <add>, %153, %cst_63 [1] : vector<48x32xf32> to vector<48xf32>
    %155 = vector.shape_cast %154 : vector<48xf32> to vector<48x1xf32>
    %cst_64 = arith.constant 3.200000e+01 : f32
    %156 = vector.broadcast %cst_64 : f32 to vector<48x1xf32>
    %157 = arith.divf %155, %156 : vector<48x1xf32>
    %cst_65 = arith.constant 9.99999974E-6 : f32
    %158 = vector.broadcast %cst_65 : f32 to vector<48x1xf32>
    %159 = arith.addf %157, %158 : vector<48x1xf32>
    %160 = math.rsqrt %159 : vector<48x1xf32>
    %161 = vector.broadcast %160 : vector<48x1xf32> to vector<48x32xf32>
    %162 = arith.mulf %152, %161 : vector<48x32xf32>
    %163 = vector.broadcast %144 : vector<1x32xf32> to vector<48x32xf32>
    %164 = arith.mulf %162, %163 : vector<48x32xf32>
    %165 = vector.broadcast %146 : vector<1x32xf32> to vector<48x32xf32>
    %166 = arith.addf %164, %165 : vector<48x32xf32>
    %c0_66 = arith.constant 0 : index
    %c0_67 = arith.constant 0 : index
    %c0_68 = arith.constant 0 : index
    %167 = vector.load %arg14[%c0_66, %c0_67, %c0_68] : memref<1x32x128xf32, #tpu.memory_space<vmem>>, vector<1x32x128xf32>
    %168 = vector.shape_cast %167 : vector<1x32x128xf32> to vector<32x128xf32>
    %cst_69 = arith.constant dense<0.000000e+00> : vector<48x128xf32>
    %169 = tpu.matmul %166, %168, %cst_69 {dimension_numbers = #tpu.dot_dimension_numbers<[1], [0], [0], [1], [0, 0, 1, 1], [], []>} : vector<48x32xf32>, vector<32x128xf32>, vector<48x128xf32> -> vector<48x128xf32>
    %c0_70 = arith.constant 0 : index
    %c0_71 = arith.constant 0 : index
    %c0_72 = arith.constant 0 : index
    %170 = vector.load %arg15[%c0_70, %c0_71, %c0_72] : memref<1x1x128xf32, #tpu.memory_space<vmem>>, vector<1x1x128xf32>
    %171 = vector.shape_cast %170 : vector<1x1x128xf32> to vector<1x128xf32>
    %172 = vector.broadcast %171 : vector<1x128xf32> to vector<48x128xf32>
    %173 = arith.addf %169, %172 : vector<48x128xf32>
    %cst_73 = arith.constant 5.000000e-01 : f32
    %174 = vector.broadcast %cst_73 : f32 to vector<48x128xf32>
    %175 = arith.mulf %174, %173 : vector<48x128xf32>
    %cst_74 = arith.constant 0.707106769 : f32
    %176 = vector.broadcast %cst_74 : f32 to vector<48x128xf32>
    %177 = arith.mulf %173, %176 : vector<48x128xf32>
    %178 = math.erf %177 : vector<48x128xf32>
    %cst_75 = arith.constant 1.000000e+00 : f32
    %179 = vector.broadcast %cst_75 : f32 to vector<48x128xf32>
    %180 = arith.addf %179, %178 : vector<48x128xf32>
    %181 = arith.mulf %175, %180 : vector<48x128xf32>
    %c0_76 = arith.constant 0 : index
    %c0_77 = arith.constant 0 : index
    %c0_78 = arith.constant 0 : index
    %182 = vector.load %arg16[%c0_76, %c0_77, %c0_78] : memref<1x128x32xf32, #tpu.memory_space<vmem>>, vector<1x128x32xf32>
    %183 = vector.shape_cast %182 : vector<1x128x32xf32> to vector<128x32xf32>
    %cst_79 = arith.constant dense<0.000000e+00> : vector<48x32xf32>
    %184 = tpu.matmul %181, %183, %cst_79 {dimension_numbers = #tpu.dot_dimension_numbers<[1], [0], [0], [1], [0, 0, 1, 1], [], []>} : vector<48x128xf32>, vector<128x32xf32>, vector<48x32xf32> -> vector<48x32xf32>
    %c0_80 = arith.constant 0 : index
    %c0_81 = arith.constant 0 : index
    %c0_82 = arith.constant 0 : index
    %185 = vector.load %arg17[%c0_80, %c0_81, %c0_82] : memref<1x1x32xf32, #tpu.memory_space<vmem>>, vector<1x1x32xf32>
    %186 = vector.shape_cast %185 : vector<1x1x32xf32> to vector<1x32xf32>
    %187 = vector.broadcast %186 : vector<1x32xf32> to vector<48x32xf32>
    %188 = arith.addf %184, %187 : vector<48x32xf32>
    %189 = arith.addf %142, %188 : vector<48x32xf32>
    %190 = vector.shape_cast %189 : vector<48x32xf32> to vector<2x24x32xf32>
    %c0_83 = arith.constant 0 : index
    %c0_84 = arith.constant 0 : index
    %c0_85 = arith.constant 0 : index
    %191 = vector.load %arg19[%c0_83, %c0_84, %c0_85] : memref<2x24x32xf32, #tpu.memory_space<vmem>>, vector<2x24x32xf32>
    tpu.vector_store %arg19[%c0_83, %c0_84, %c0_85], %190 {strides = array<i32>} : memref<2x24x32xf32, #tpu.memory_space<vmem>>, vector<2x24x32xf32>,
    %c2_i32 = arith.constant 2 : i32
    %192 = arith.cmpi eq, %arg0, %c2_i32 : i32
    %193 = arith.extui %192 : i1 to i32
    %c0_i32_86 = arith.constant 0 : i32
    %194 = arith.cmpi ne, %193, %c0_i32_86 : i32
    scf.if %194 {
      %c0_90 = arith.constant 0 : index
      %c0_91 = arith.constant 0 : index
      %c0_92 = arith.constant 0 : index
      %204 = vector.load %arg18[%c0_90, %c0_91, %c0_92] : memref<2x24x128xf32, #tpu.memory_space<vmem>>, vector<2x24x32xf32>
      tpu.vector_store %arg18[%c0_90, %c0_91, %c0_92], %190 {strides = array<i32>} : memref<2x24x128xf32, #tpu.memory_space<vmem>>, vector<2x24x32xf32>,
    } else {
    }
    %c5_i32 = arith.constant 5 : i32
    %195 = arith.cmpi eq, %arg0, %c5_i32 : i32
    %196 = arith.extui %195 : i1 to i32
    %c0_i32_87 = arith.constant 0 : i32
    %197 = arith.cmpi ne, %196, %c0_i32_87 : i32
    scf.if %197 {
      %c0_90 = arith.constant 0 : index
      %c0_91 = arith.constant 0 : index
      %c32 = arith.constant 32 : index
      %204 = vector.load %arg18[%c0_90, %c0_91, %c32] : memref<2x24x128xf32, #tpu.memory_space<vmem>>, vector<2x24x32xf32>
      tpu.vector_store %arg18[%c0_90, %c0_91, %c32], %190 {strides = array<i32>} : memref<2x24x128xf32, #tpu.memory_space<vmem>>, vector<2x24x32xf32>,
    } else {
    }
    %c8_i32 = arith.constant 8 : i32
    %198 = arith.cmpi eq, %arg0, %c8_i32 : i32
    %199 = arith.extui %198 : i1 to i32
    %c0_i32_88 = arith.constant 0 : i32
    %200 = arith.cmpi ne, %199, %c0_i32_88 : i32
    scf.if %200 {
      %c0_90 = arith.constant 0 : index
      %c0_91 = arith.constant 0 : index
      %c64 = arith.constant 64 : index
      %204 = vector.load %arg18[%c0_90, %c0_91, %c64] : memref<2x24x128xf32, #tpu.memory_space<vmem>>, vector<2x24x32xf32>
      tpu.vector_store %arg18[%c0_90, %c0_91, %c64], %190 {strides = array<i32>} : memref<2x24x128xf32, #tpu.memory_space<vmem>>, vector<2x24x32xf32>,
    } else {
    }
    %c11_i32 = arith.constant 11 : i32
    %201 = arith.cmpi eq, %arg0, %c11_i32 : i32
    %202 = arith.extui %201 : i1 to i32
    %c0_i32_89 = arith.constant 0 : i32
    %203 = arith.cmpi ne, %202, %c0_i32_89 : i32
    scf.if %203 {
      %c0_90 = arith.constant 0 : index
      %c0_91 = arith.constant 0 : index
      %c96 = arith.constant 96 : index
      %204 = vector.load %arg18[%c0_90, %c0_91, %c96] : memref<2x24x128xf32, #tpu.memory_space<vmem>>, vector<2x24x32xf32>
      tpu.vector_store %arg18[%c0_90, %c0_91, %c96], %190 {strides = array<i32>} : memref<2x24x128xf32, #tpu.memory_space<vmem>>, vector<2x24x32xf32>,
    } else {
    }
    return
  }
  func.func @transform_0(%arg0: i32) -> (i32, i32) {
    %c0_i32 = arith.constant 0 : i32
    %c0_i32_0 = arith.constant 0 : i32
    %c0_i32_1 = arith.constant 0 : i32
    return %c0_i32, %c0_i32_0 : i32, i32
  }
  func.func @transform_1(%arg0: i32) -> (i32, i32) {
    %c0_i32 = arith.constant 0 : i32
    %c0_i32_0 = arith.constant 0 : i32
    %c0_i32_1 = arith.constant 0 : i32
    return %c0_i32, %c0_i32_0 : i32, i32
  }
  func.func @transform_2(%arg0: i32) -> (i32, i32) {
    %c0_i32 = arith.constant 0 : i32
    %c0_i32_0 = arith.constant 0 : i32
    %c0_i32_1 = arith.constant 0 : i32
    return %c0_i32, %c0_i32_0 : i32, i32
  }
  func.func @transform_3(%arg0: i32) -> (i32, i32) {
    %c0_i32 = arith.constant 0 : i32
    %c0_i32_0 = arith.constant 0 : i32
    %c0_i32_1 = arith.constant 0 : i32
    return %c0_i32, %c0_i32_0 : i32, i32
  }
  func.func @transform_4(%arg0: i32) -> (i32, i32) {
    %c0_i32 = arith.constant 0 : i32
    %c0_i32_0 = arith.constant 0 : i32
    %c0_i32_1 = arith.constant 0 : i32
    return %c0_i32, %c0_i32_0 : i32, i32
  }
  func.func @transform_5(%arg0: i32) -> (i32, i32, i32) {
    %c0_i32 = arith.constant 0 : i32
    %c0_i32_0 = arith.constant 0 : i32
    %c0_i32_1 = arith.constant 0 : i32
    return %arg0, %c0_i32, %c0_i32_0 : i32, i32, i32
  }
  func.func @transform_6(%arg0: i32) -> (i32, i32, i32) {
    %c0_i32 = arith.constant 0 : i32
    %c0_i32_0 = arith.constant 0 : i32
    %c0_i32_1 = arith.constant 0 : i32
    return %arg0, %c0_i32, %c0_i32_0 : i32, i32, i32
  }
  func.func @transform_7(%arg0: i32) -> (i32, i32, i32) {
    %c0_i32 = arith.constant 0 : i32
    %c0_i32_0 = arith.constant 0 : i32
    %c0_i32_1 = arith.constant 0 : i32
    return %arg0, %c0_i32, %c0_i32_0 : i32, i32, i32
  }
  func.func @transform_8(%arg0: i32) -> (i32, i32, i32) {
    %c0_i32 = arith.constant 0 : i32
    %c0_i32_0 = arith.constant 0 : i32
    %c0_i32_1 = arith.constant 0 : i32
    return %arg0, %c0_i32, %c0_i32_0 : i32, i32, i32
  }
  func.func @transform_9(%arg0: i32) -> (i32, i32, i32) {
    %c0_i32 = arith.constant 0 : i32
    %c0_i32_0 = arith.constant 0 : i32
    %c0_i32_1 = arith.constant 0 : i32
    return %arg0, %c0_i32, %c0_i32_0 : i32, i32, i32
  }
  func.func @transform_10(%arg0: i32) -> (i32, i32, i32) {
    %c0_i32 = arith.constant 0 : i32
    %c0_i32_0 = arith.constant 0 : i32
    %c0_i32_1 = arith.constant 0 : i32
    return %arg0, %c0_i32, %c0_i32_0 : i32, i32, i32
  }
  func.func @transform_11(%arg0: i32) -> (i32, i32, i32) {
    %c0_i32 = arith.constant 0 : i32
    %c0_i32_0 = arith.constant 0 : i32
    %c0_i32_1 = arith.constant 0 : i32
    return %arg0, %c0_i32, %c0_i32_0 : i32, i32, i32
  }
  func.func @transform_12(%arg0: i32) -> (i32, i32, i32) {
    %c0_i32 = arith.constant 0 : i32
    %c0_i32_0 = arith.constant 0 : i32
    %c0_i32_1 = arith.constant 0 : i32
    return %arg0, %c0_i32, %c0_i32_0 : i32, i32, i32
  }
  func.func @transform_13(%arg0: i32) -> (i32, i32, i32) {
    %c0_i32 = arith.constant 0 : i32
    %c0_i32_0 = arith.constant 0 : i32
    %c0_i32_1 = arith.constant 0 : i32
    return %arg0, %c0_i32, %c0_i32_0 : i32, i32, i32
  }
  func.func @transform_14(%arg0: i32) -> (i32, i32, i32) {
    %c0_i32 = arith.constant 0 : i32
    %c0_i32_0 = arith.constant 0 : i32
    %c0_i32_1 = arith.constant 0 : i32
    return %arg0, %c0_i32, %c0_i32_0 : i32, i32, i32
  }
  func.func @transform_15(%arg0: i32) -> (i32, i32, i32) {
    %c0_i32 = arith.constant 0 : i32
    %c0_i32_0 = arith.constant 0 : i32
    %c0_i32_1 = arith.constant 0 : i32
    return %arg0, %c0_i32, %c0_i32_0 : i32, i32, i32
  }
  func.func @transform_16(%arg0: i32) -> (i32, i32, i32) {
    %c0_i32 = arith.constant 0 : i32
    %c0_i32_0 = arith.constant 0 : i32
    %c0_i32_1 = arith.constant 0 : i32
    return %arg0, %c0_i32, %c0_i32_0 : i32, i32, i32
  }
  func.func @transform_17(%arg0: i32) -> (i32, i32, i32) {
    %c0_i32 = arith.constant 0 : i32
    %c0_i32_0 = arith.constant 0 : i32
    %c0_i32_1 = arith.constant 0 : i32
    %c0_i32_2 = arith.constant 0 : i32
    return %c0_i32, %c0_i32_0, %c0_i32_1 : i32, i32, i32
  }
}

</mosaic_0001>

<bundles_post_ra>
// kernel: unetr_encoder_forward.1
= control target key start
LH: loop header
LB: loop body
LE: loop exit
PB: predicated region body
PF: predicated region fallthrough
CT: control target
= control target key end

     0   :  { %s5336_s24 = smov 0   ;;  %s6313_s0 = inlined_call_operand.vmem [shape: f32[32,48], index: 0, kind: input, shape index: {}]   ;;  %s6314_s1 = inlined_call_operand.vmem [shape: f32[48,32], index: 1, kind: input, shape index: {}]   ;;  %s6315_s2 = inlined_call_operand.vmem [shape: f32[1,32], index: 2, kind: input, shape index: {}]   ;;  %s6316_s3 = inlined_call_operand.vmem [shape: f32[16,32], index: 3, kind: input, shape index: {}]   ;;  %s6317_s4 = inlined_call_operand.vmem [shape: f32[1,32], index: 4, kind: input, shape index: {}]   ;;  %s6318_s5 = inlined_call_operand.vmem [shape: f32[12,1,32], index: 5, kind: input, shape index: {}]   ;;  %s6319_s6 = inlined_call_operand.vmem [shape: f32[12,1,32], index: 6, kind: input, shape index: {}]   ;;  %s6320_s7 = inlined_call_operand.vmem [shape: f32[12,32,96], index: 7, kind: input, shape index: {}]   ;;  %s6321_s8 = inlined_call_operand.vmem [shape: f32[12,1,96], index: 8, kind: input, shape index: {}]   ;;  %s6322_s9 = inlined_call_operand.vmem [shape: f32[12,32,32], index: 9, kind: input, shape index: {}]   ;;  %s6323_s10 = inlined_call_operand.vmem [shape: f32[12,1,32], index: 10, kind: input, shape index: {}]   ;;  %s6324_s11 = inlined_call_operand.vmem [shape: f32[12,1,32], index: 11, kind: input, shape index: {}]   ;;  %s6325_s12 = inlined_call_operand.vmem [shape: f32[12,1,32], index: 12, kind: input, shape index: {}]   ;;  %s6326_s13 = inlined_call_operand.vmem [shape: f32[12,32,128], index: 13, kind: input, shape index: {}]   ;;  %s6327_s14 = inlined_call_operand.vmem [shape: f32[12,1,128], index: 14, kind: input, shape index: {}]   ;;  %s6328_s15 = inlined_call_operand.vmem [shape: f32[12,128,32], index: 15, kind: input, shape index: {}]   ;;  %s6329_s16 = inlined_call_operand.vmem [shape: f32[12,1,32], index: 16, kind: input, shape index: {}]   ;;  %s6330_s17 = inlined_call_operand.vmem [shape: f32[2,24,128], index: 17, kind: output, shape index: {}]  }
   0x1   :  { %6339 = sst [smem:[#allocation5_spill]] %s6313_s0 }
   0x2   :  { %6340 = sst [smem:[#allocation6_spill]] %s6314_s1 }
   0x3   :  { %6341 = sst [smem:[#allocation7_spill]] %s6318_s5 }
   0x4   :  { %6342 = sst [smem:[#allocation8_spill]] %s6319_s6 }
   0x5   :  { %6343 = sst [smem:[#allocation9_spill]] %s6320_s7 }
   0x6   :  { %6344 = sst [smem:[#allocation10_spill]] %s6322_s9 }
   0x7   :  { %6345 = sst [smem:[#allocation11_spill]] %s6330_s17 }
   0x8 LB: > { %6346 = sst [smem:[#allocation3_spill]] %s5226_s24  ;;  %s5342_s25 = sadd.s32 4294967295, %s5226_s24   ;;  %s5226_s24 = sphi %s5336_s24, %s27_s24  }
   0x9   : > { %p4142_p0 = scmp.ge.s32.totalorder %s5226_s24, 1  ;;  %p576_p1 = scmp.lt.s32.totalorder %s5226_s24, 13 }
   0xb   : > { %p577_p2 = pnand %p4142_p0, %p576_p1 }
   0xd   : > { %580 = sbr.rel (%p577_p2) target bundleno = 4977 (0x1371), region = 88 }
  0x14   : > { %p662_p3 = scmp.lt.s32.totalorder %s5342_s25, 11  ;;  %s6349_s7 = sld [smem:[#allocation9_spill]] }
  0x15   : > { %s6350_s9 = sld [smem:[#allocation10_spill]]  ;;  %p4151_p4 = scmp.ne.s32.totalorder %s5342_s25, 0 }
  0x16   : > { %s5348_s26 = scalar_select %p662_p3, %s5342_s25, 11 }
  0x17   : > { %709 = sbr.rel (%p4151_p4) target bundleno = 262 (0x106), region = 92  ;;  %s6352_s22 = sld [smem:[#allocation6_spill]] (!%p4151_p4)  ;;  %vm710_vm0 = vcmask (!%p4151_p4), 261120   ;;  %v5228_v5 = vmov (!%p4151_p4), 0.0   ;;  %vm734_vm1 = vcmask (!%p4151_p4), 392192   ;;  %vm833_vm2 = vcmask (!%p4151_p4), 253952  }
  0x18   : > { %s4279_s19 = sshll.u32 %s5348_s26, 5  ;;  %s686_s6 = scalar_lea.vmem %s6324_s11, %s5348_s26  ;;  %712 = vst.msk [vmem:[#allocation2 + $0x8] sm:$0xff] (!%p4151_p4), %vm710_vm0, %v5228_v5  ;;  %713 = vst.msk [vmem:[#allocation2 + $0x10] sm:$0xff] (!%p4151_p4), %vm710_vm0, %v5228_v5  ;;  %v832_v14 = vld [vmem:[%s6317_s4] sm:$0x1] (!%p4151_p4)  ;;  %v836_v18 = vld [vmem:[%s6316_s3 + $0x8] sm:$0xff] (!%p4151_p4) }
  0x19   : > { %s689_s21 = scalar_lea.vmem %s6325_s12, %s5348_s26  ;;  %s705_s1 = scalar_lea.vmem %s6329_s16, %s5348_s26  ;;  %711 = vst.msk [vmem:[#allocation2] sm:$0xff] (!%p4151_p4), %vm710_vm0, %v5228_v5  ;;  %714 = vst.msk [vmem:[#allocation2 + $0x18] sm:$0xff] (!%p4151_p4), %vm710_vm0, %v5228_v5  ;;  %v841_v15 = vld [vmem:[%s6317_s4] sm:$0x1] (!%p4151_p4) }
  0x1a   : > { %s5366_s27 = scalar_lea.vmem %s6349_s7, %s4279_s19  ;;  %s5388_s7 = scalar_lea.vmem %s6326_s13, %s4279_s19  ;;  %715 = vst.msk [vmem:[#allocation2 + $0x20] sm:$0xff] (!%p4151_p4), %vm710_vm0, %v5228_v5  ;;  %716 = vst.msk [vmem:[#allocation2 + $0x28] sm:$0xff] (!%p4151_p4), %vm710_vm0, %v5228_v5  ;;  %v4152_v16 = vld [vmem:[%s6315_s2] ss:$0 sm:$0xff] (!%p4151_p4) }
  0x1b   : > { %s5371_s17 = scalar_lea.vmem %s6350_s9, %s4279_s19  ;;  %s6353_s23 = sld [smem:[#allocation5_spill]] (!%p4151_p4)  ;;  %834 = vst.msk [vmem:[#allocation2] sm:$0x1] (!%p4151_p4), %vm833_vm2, %v832_v14  ;;  %843 = vst.msk [vmem:[#allocation2 + $0x18] sm:$0x1] (!%p4151_p4), %vm833_vm2, %v841_v15  ;;  %v835_v23 = vld [vmem:[%s6316_s3] sm:$0xff] (!%p4151_p4) }
  0x1c   : > { %6351 = sst [smem:[#allocation4_spill]] %s5371_s17  ;;  %s4282_s17 = sshll.u32 %s5348_s26, 7 }
  0x1d   : > { %s5398_s0 = scalar_lea.vmem %s6328_s15, %s4282_s17  ;;  %v721_v0 = vld [vmem:[%s6352_s22] sm:$0xff] (!%p4151_p4)  ;;  %v722_v1 = vld [vmem:[%s6352_s22 + $0x8] sm:$0xff] (!%p4151_p4)  ;;  %v723_v2 = vld [vmem:[%s6352_s22 + $0x10] sm:$0xff] (!%p4151_p4) }
  0x1e   : > { %v4836_v3 = vpack.c.bf16 %v722_v1, %v721_v0  ;;  %v724_v4 = vld [vmem:[%s6352_s22 + $0x18] sm:$0xff]  ;;  %v725_v7 = vld [vmem:[%s6352_s22 + $0x20] sm:$0xff]  ;;  %v726_v8 = vld [vmem:[%s6352_s22 + $0x28] sm:$0xff] }
  0x1f   : > { %v4840_v6 = vpack.c.bf16 %v724_v4, %v723_v2  ;;  %v4844_v11 = vpack.c.bf16 %v726_v8, %v725_v7 }
  0x20   : > { %4837 = vmatprep.subr.bf16.mxu0 %v4836_v3  ;;  %4952 = vmatprep.subr.bf16.mxu1 %v4836_v3 }
  0x21   : > { %v717_v9 = vld [vmem:[%s6353_s23] sm:$0xff]  ;;  %v719_v10 = vld [vmem:[%s6353_s23 + $0x10] sm:$0xff]  ;;  %4839 = vmatpush3.bf16.msra.mxu0 %v4836_v3  ;;  %4955 = vmatpush3.bf16.msra.mxu1 %v4836_v3  ;;  %v718_v12 = vld [vmem:[%s6353_s23 + $0x8] sm:$0xff] }
  0x22   : > { %4841 = vmatprep.subr.bf16.mxu0 %v4840_v6  ;;  %4953 = vmatprep.subr.bf16.mxu1 %v4840_v6  ;;  %v720_v13 = vld [vmem:[%s6353_s23 + $0x18] sm:$0xff] }
  0x23   : > { %4471 = vmatprep.mubr.msk.f32.mxu0 %vm734_vm1, %v717_v9  ;;  %4474 = vmatprep.mubr.msk.f32.mxu1 %vm734_vm1, %v719_v10 }
  0x25   : > { %4843 = vmatpush3.bf16.msra.mxu0 %v4840_v6  ;;  %4956 = vmatpush3.bf16.msra.mxu1 %v4840_v6 }
  0x26   : > { %4845 = vmatprep.subr.bf16.mxu0 %v4844_v11  ;;  %4954 = vmatprep.subr.bf16.mxu1 %v4844_v11 }
  0x29   : > { %4847 = vmatpush3.bf16.msra.mxu0 %v4844_v11  ;;  %4957 = vmatpush3.bf16.msra.mxu1 %v4844_v11 }
  0x2c   : > { %4472 = vmatmul.mubr.msk.f32.vlgmr.msra.gmra.mrb[0].mxu0 %vm734_vm1, %v718_v12  ;;  %4475 = vmatmul.mubr.msk.f32.vlgmr.msra.gmra.mrb[0].mxu1 %vm734_vm1, %v720_v13 }
  0xff   : > { %v4473_v17 = vpop.f32.mrb[0].mxu0  ;;  %v4476_v19 = vpop.f32.mrb[0].mxu1 }
 0x100   : > { %v819_v20 = vadd.f32 %v4473_v17, %v4152_v16  ;;  %v829_v21 = vadd.f32 %v4476_v19, %v4152_v16  ;;  %v813_v22 = vpop.f32.mrb[1].mxu0  ;;  %v823_v24 = vpop.f32.mrb[1].mxu1 }
 0x101   : > { %v814_v25 = vadd.f32 %v4152_v16, %v813_v22  ;;  %v824_v26 = vadd.f32 %v4152_v16, %v823_v24 }
 0x102   : > { %v838_v27 = vadd.f32 %v836_v18, %v819_v20  ;;  %v847_v28 = vadd.f32 %v836_v18, %v829_v21 }
 0x103   : > { %v837_v29 = vadd.f32 %v835_v23, %v814_v25  ;;  %v846_v30 = vadd.f32 %v835_v23, %v824_v26 }
 0x104   : > { %840 = vst.msk [vmem:[#allocation2 + $0x9] sm:$0xff] %vm710_vm0, %v838_v27  ;;  %849 = vst.msk [vmem:[#allocation2 + $0x21] sm:$0xff] %vm710_vm0, %v847_v28 }
 0x105   : > { %839 = vst.msk [vmem:[#allocation2 + $0x1] sm:$0xff] %vm710_vm0, %v837_v29  ;;  %848 = vst.msk [vmem:[#allocation2 + $0x19] sm:$0xff] %vm710_vm0, %v846_v30 }
 0x106 PF: > { %vm858_vm3 = vcmask 261120   ;;  %v962_v9 = vld [vmem:[%s5366_s27] sm:$0xff]  ;;  %v963_v10 = vld [vmem:[%s5366_s27 + $0x8] sm:$0xff]  ;;  %v964_v12 = vld [vmem:[%s5366_s27 + $0x10] sm:$0xff]  ;;  %s6354_s30 = sld [smem:[#allocation7_spill]]  ;;  %s6356_s28 = sld [smem:[#allocation8_spill]] }
 0x107   : > { %v4848_v11 = vpack.c.bf16 %v963_v10, %v962_v9  ;;  %v965_v13 = vld [vmem:[%s5366_s27 + $0x18] sm:$0xff]  ;;  %s6358_s29 = scalar_lea.vmem %s6321_s8, %s5348_s26  ;;  %s5230_s27 = smov 96   ;;  %vm5231_vm4 = vmmov 0   ;;  %vm1102_vm5 = vcmask 64512   ;;  %vm1308_vm8 = vcmask 195584  }
 0x108   : > { %v4852_v14 = vpack.c.bf16 %v965_v13, %v964_v12  ;;  %vm5563_vm6 = vmpackc.low %vm1102_vm5, %vm1102_vm5  ;;  %s5233_s18 = smov 64   ;;  %s5236_s19 = smov 56  }
 0x109   : > { %4849 = vmatprep.subr.bf16.mxu0 %v4848_v11  ;;  %s5237_s24 = smov 80   ;;  %s5239_s5 = smov 48  }
 0x10a   : > { %4851 = vmatpush3.bf16.msra.mxu0 %v4848_v11  ;;  %s5240_s9 = smov 72   ;;  %p4273_p5 = scmp.ne.s32.totalorder %s5342_s25, 2 }
 0x10b   : > { %v852_v32 = vld [vmem:[#allocation2 + $0x10] sm:$0xff]  ;;  %v855_v40 = vld [vmem:[#allocation2 + $0x28] sm:$0xff]  ;;  %4853 = vmatprep.subr.bf16.mxu0 %v4852_v14 }
 0x10c   : > { %v850_v31 = vld [vmem:[#allocation2] sm:$0xff]  ;;  %v851_v33 = vld [vmem:[#allocation2 + $0x8] sm:$0xff]  ;;  %v865_v35 = vsel %vm858_vm3, %v852_v32, 0.0  ;;  %v853_v36 = vld [vmem:[#allocation2 + $0x18] sm:$0xff]  ;;  %v874_v42 = vsel %vm858_vm3, %v855_v40, 0.0  ;;  %s6355_s20 = scalar_lea.vmem %s6354_s30, %s5348_s26  ;;  %s6357_s17 = scalar_lea.vmem %s6356_s28, %s5348_s26 }
 0x10d   : > { %v859_v34 = vsel %vm858_vm3, %v850_v31, 0.0  ;;  %866 = vadd.xlane.f32.xlu1 %v865_v35  ;;  %v862_v37 = vsel %vm858_vm3, %v851_v33, 0.0  ;;  %v868_v38 = vsel %vm858_vm3, %v853_v36, 0.0  ;;  %v854_v39 = vld [vmem:[#allocation2 + $0x20] sm:$0xff]  ;;  %s5234_s30 = smov 88   ;;  %s5238_s28 = smov 112  }
 0x10e   : > { %860 = vadd.xlane.f32.xlu0 %v859_v34  ;;  %v871_v41 = vsel %vm858_vm3, %v854_v39, 0.0  ;;  %4855 = vmatpush3.bf16.msra.mxu0 %v4852_v14  ;;  %v4157_v34 = vld [vmem:[%s6355_s20] ss:$0 sm:$0xff]  ;;  %s5235_s20 = smov 120  }
 0x111   : > { %869 = vadd.xlane.f32.xlu1 %v868_v38 }
 0x112   : > { %863 = vadd.xlane.f32.xlu0 %v862_v37 }
 0x115   : > { %875 = vadd.xlane.f32.xlu1 %v874_v42 }
 0x116   : > { %872 = vadd.xlane.f32.xlu0 %v871_v41 }
 0x19a   : > { %v867_v44 = vpop.xlane.xlu1 %866 }
 0x19b   : > { %v861_v43 = vpop.xlane.xlu0 %860  ;;  %v880_v46 = vmul.f32 0.03125, %v867_v44 }
 0x19c   : > { %v878_v45 = vmul.f32 0.03125, %v861_v43 }
 0x19d   : > { %v5472_v48 = vsub.f32 %v852_v32, %v880_v46 }
 0x19e   : > { %v5470_v47 = vsub.f32 %v850_v31, %v878_v45  ;;  %v870_v50 = vpop.xlane.xlu1 %869 }
 0x19f   : > { %v864_v49 = vpop.xlane.xlu0 %863  ;;  %v881_v52 = vmul.f32 0.03125, %v870_v50  ;;  %v892_v54 = vmul.f32 %v5472_v48, %v5472_v48 }
 0x1a0   : > { %v879_v51 = vmul.f32 0.03125, %v864_v49  ;;  %v890_v53 = vmul.f32 %v5470_v47, %v5470_v47 }
 0x1a1   : > { %v5480_v56 = vsub.f32 %v853_v36, %v881_v52  ;;  %v902_v60 = vsel %vm858_vm3, %v892_v54, 0.0  ;;  %v4158_v36 = vld [vmem:[%s6357_s17] ss:$0 sm:$0xff]  ;;  %s6361_s17 = sld [smem:[#allocation4_spill]] }
 0x1a2   : > { %v5478_v55 = vsub.f32 %v851_v33, %v879_v51  ;;  %v896_v57 = vsel %vm858_vm3, %v890_v53, 0.0  ;;  %v876_v59 = vpop.xlane.xlu1 %875 }
 0x1a3   : > { %897 = vadd.xlane.f32.xlu0 %v896_v57  ;;  %v873_v58 = vpop.xlane.xlu0 %872  ;;  %v883_v62 = vmul.f32 0.03125, %v876_v59  ;;  %v893_v0 = vmul.f32 %v5480_v56, %v5480_v56  ;;  %v5229_v59 = vmov 0.0|0.0  }
 0x1a4   : > { %v882_v61 = vmul.f32 0.03125, %v873_v58  ;;  %v891_v63 = vmul.f32 %v5478_v55, %v5478_v55  ;;  %4856 = vmatprep.subr.bf16.mxu1 %v5229_v59  ;;  %4867 = vmatprep.subr.bf16.mxu0 %v5229_v59 }
 0x1a5   : > { %v5490_v2 = vsub.f32 %v855_v40, %v883_v62  ;;  %v905_v4 = vsel %vm858_vm3, %v893_v0, 0.0 }
 0x1a6   : > { %v5488_v1 = vsub.f32 %v854_v39, %v882_v61  ;;  %v899_v3 = vsel %vm858_vm3, %v891_v63, 0.0 }
 0x1a7   : > { %903 = vadd.xlane.f32.xlu0 %v902_v60  ;;  %900 = vadd.xlane.f32.xlu1 %v899_v3  ;;  %v895_v6 = vmul.f32 %v5490_v2, %v5490_v2  ;;  %v4159_v60 = vld [vmem:[%s6358_s29] ss:$0 sm:$0xff]  ;;  %s5241_s29 = smov 104  }
 0x1a8   : > { %v894_v5 = vmul.f32 %v5488_v1, %v5488_v1 }
 0x1a9   : > { %v911_v8 = vsel %vm858_vm3, %v895_v6, 0.0 }
 0x1aa   : > { %v908_v7 = vsel %vm858_vm3, %v894_v5, 0.0  ;;  %v5232_v5 = vmov 0.0  }
 0x1ab   : > { %906 = vadd.xlane.f32.xlu1 %v905_v4  ;;  %909 = vadd.xlane.f32.xlu0 %v908_v7 }
 0x1ac   : > { %4500 = vmatprep.mubr.msk.f32.mxu1 %vm5231_vm4, %v5232_v5 }
 0x1af   : > { %912 = vadd.xlane.f32.xlu1 %v911_v8 }
 0x230   : > { %v898_v15 = vpop.xlane.xlu0 %897 }
 0x231   : > { %v914_v16 = vmul.f32 0.03125, %v898_v15 }
 0x233   : > { %v920_v17 = vadd.f32 1e-05, %v914_v16 }
 0x234   : > { %v901_v18 = vpop.xlane.xlu1 %900  ;;  %v904_v19 = vpop.xlane.xlu0 %903 }
 0x235   : > { %5082 = vrsqrt.f32 %v920_v17  ;;  %v915_v20 = vmul.f32 0.03125, %v901_v18  ;;  %v916_v21 = vmul.f32 0.03125, %v904_v19 }
 0x237   : > { %v921_v22 = vadd.f32 1e-05, %v915_v20  ;;  %v922_v23 = vadd.f32 1e-05, %v916_v21 }
 0x238   : > { %v907_v24 = vpop.xlane.xlu1 %906  ;;  %v910_v25 = vpop.xlane.xlu0 %909 }
 0x239   : > { %5084 = vrsqrt.f32 %v921_v22  ;;  %v917_v26 = vmul.f32 0.03125, %v907_v24  ;;  %v918_v27 = vmul.f32 0.03125, %v910_v25 }
 0x23a   : > { %5086 = vrsqrt.f32 %v922_v23 }
 0x23b   : > { %v923_v28 = vadd.f32 1e-05, %v917_v26  ;;  %v924_v29 = vadd.f32 1e-05, %v918_v27  ;;  %v1086_v27 = vlaneseq }
 0x23c   : > { %v913_v30 = vpop.xlane.xlu1 %912 }
 0x23d   : > { %5088 = vrsqrt.f32 %v923_v28  ;;  %v919_v31 = vmul.f32 0.03125, %v913_v30  ;;  %v5601_v30 = vand.u32 127, %v1086_v27 }
 0x23e   : > { %5090 = vrsqrt.f32 %v924_v29 }
 0x23f   : > { %v5083_v32 = vpop.eup %5082  ;;  %v925_v33 = vadd.f32 1e-05, %v919_v31  ;;  %vm1088_vm7 = vcmp.lt.s32.totalorder %v5601_v30, 17 }
 0x240   : > { %v932_v35 = vmul.f32 %v5083_v32, %v5470_v47 }
 0x241   : > { %5092 = vrsqrt.f32 %v925_v33 }
 0x242   : > { %v944_v37 = vmul.f32 %v4157_v34, %v932_v35 }
 0x243   : > { %v5085_v38 = vpop.eup %5084 }
 0x244   : > { %v5087_v39 = vpop.eup %5086  ;;  %v956_v40 = vadd.f32 %v4158_v36, %v944_v37  ;;  %v933_v41 = vmul.f32 %v5085_v38, %v5478_v55 }
 0x245   : > { %v934_v42 = vmul.f32 %v5087_v39, %v5472_v48 }
 0x246   : > { %4485 = vmatprep.mubr.msk.f32.mxu0 %vm858_vm3, %v956_v40  ;;  %v945_v43 = vmul.f32 %v4157_v34, %v933_v41 }
 0x247   : > { %v5089_v44 = vpop.eup %5088  ;;  %v946_v45 = vmul.f32 %v4157_v34, %v934_v42 }
 0x248   : > { %v5091_v46 = vpop.eup %5090  ;;  %v957_v47 = vadd.f32 %v4158_v36, %v945_v43  ;;  %v935_v49 = vmul.f32 %v5089_v44, %v5480_v56 }
 0x249   : > { %v958_v50 = vadd.f32 %v4158_v36, %v946_v45  ;;  %v936_v51 = vmul.f32 %v5091_v46, %v5488_v1 }
 0x24a   : > { %4486 = vmatmul.mubr.msk.f32.vlgmr.msra.gmra.mrb[0].mxu0 %vm858_vm3, %v957_v47  ;;  %v947_v52 = vmul.f32 %v4157_v34, %v935_v49 }
 0x24b   : > { %v5093_v53 = vpop.eup %5092  ;;  %4488 = vmatprep.mubr.msk.f32.mxu0 %vm858_vm3, %v958_v50  ;;  %v948_v48 = vmul.f32 %v4157_v34, %v936_v51 }
 0x24c   : > { %v959_v54 = vadd.f32 %v4158_v36, %v947_v52  ;;  %v937_v55 = vmul.f32 %v5093_v53, %v5490_v2 }
 0x24d   : > { %v960_v57 = vadd.f32 %v4158_v36, %v948_v48 }
 0x24e   : > { %4489 = vmatmul.mubr.msk.f32.gmra.mrb[2].mxu0 %vm858_vm3, %v959_v54  ;;  %v949_v58 = vmul.f32 %v4157_v34, %v937_v55 }
 0x24f   : > { %4491 = vmatprep.mubr.msk.f32.mxu0 %vm858_vm3, %v960_v57 }
 0x250   : > { %v961_v56 = vadd.f32 %v4158_v36, %v949_v58 }
 0x252   : > { %4492 = vmatmul.mubr.msk.f32.gmra.mrb[4].mxu0 %vm858_vm3, %v961_v56 }
 0x253   : > { %4545 = vmatprep.mubr.msk.f32.mxu0 %vm5231_vm4, %v5232_v5 }
 0x31d   : > { %v4487_v61 = vpop.f32.mrb[0].mxu0 }
 0x31e   : > { %v5533_v62 = vadd.f32 %v4487_v61, %v4159_v60  ;;  %v1057_v63 = vpop.f32.mrb[1].mxu0 }
 0x31f   : > { %v5535_v0 = vadd.f32 %v4159_v60, %v1057_v63 }
 0x321   : > { %v4490_v1 = vpop.f32.mrb[2].mxu0  ;;  %v5539_v2 = vpack.i.bf16 %v5533_v62, %v5535_v0 }
 0x322   : > { %v1067_v3 = vpop.f32.mrb[3].mxu0  ;;  %v5549_v8 = vadd.f32 %v4490_v1, %v4159_v60 }
 0x323   : > { %v5541_v4 = vadd.f32 %v4159_v60, %v1067_v3  ;;  %5003 = vrot.lane.b32.xlu0 %v5539_v2, %s5230_s27 }
 0x325   : > { %1100 = vrot.lane.b32.xlu1 %v5541_v4, %s5230_s27  ;;  %v4493_v6 = vpop.f32.mrb[4].mxu0 }
 0x326   : > { %v1077_v7 = vpop.f32.mrb[5].mxu0  ;;  %v5558_v11 = vadd.f32 %v4493_v6, %v4159_v60 }
 0x327   : > { %v5551_v9 = vadd.f32 %v4159_v60, %v1077_v7 }
 0x329   : > { %v5555_v10 = vpack.i.bf16 %v5551_v9, %v5549_v8 }
 0x32b   : > { %5008 = vrot.lane.b32.xlu1 %v5555_v10, %s5230_s27 }
 0x32f   : > { %1202 = vrot.lane.b32.xlu1 %v5558_v11, %s5230_s27  ;;  %s5242_s27 = smov 40  }
 0x395   : > { %v5004_v12 = vpop.permute.xlu0 %5003 }
 0x396   : > { %v5006_v13 = vunpack.i.h.bf16 %v5004_v12  ;;  %v5005_v14 = vunpack.i.l.bf16 %v5004_v12 }
 0x397   : > { %v1101_v17 = vpop.permute.xlu1 %1100 }
 0x398   : > { %v4857_v16 = vpack.c.bf16 %v5006_v13, %v5005_v14 }
 0x39a   : > { %4859 = vmatpush3.bf16.xpose.msk.msra.mxu1 %vm5563_vm6, %v4857_v16 }
 0x39b   : > { %4498 = vmatprep.subr.mxu1 %v5232_v5 }
 0x39d   : > { %v5009_v18 = vpop.permute.xlu1 %5008 }
 0x39e   : > { %v5011_v19 = vunpack.i.h.bf16 %v5009_v18  ;;  %v5010_v20 = vunpack.i.l.bf16 %v5009_v18 }
 0x3a0   : > { %v4861_v21 = vpack.c.bf16 %v5011_v19, %v5010_v20 }
 0x3a1   : > { %v1203_v22 = vpop.permute.xlu1 %1202 }
 0x3a2   : > { %4499 = vmatpush3.xpose.msk.msra.mxu1 %vm1102_vm5, %v1101_v17 }
 0x3a3   : > { %4860 = vmatprep.subr.bf16.mxu1 %v5229_v59 }
 0x3a5   : > { %4501 = vmatmul.mubr.msk.f32.vlgmr.msra.gmra.mrb[0].mxu1 %vm1102_vm5, %v5535_v0 }
 0x3a6   : > { %4863 = vmatpush3.bf16.xpose.msk.msra.mxu1 %vm5563_vm6, %v4861_v21  ;;  %4503 = vmatprep.mubr.msk.f32.mxu1 %vm5231_vm4, %v5232_v5 }
 0x3a7   : > { %4513 = vmatprep.subr.mxu1 %v5232_v5 }
 0x3a9   : > { %4504 = vmatmul.mubr.msk.f32.gmra.mrb[2].mxu1 %vm1102_vm5, %v5533_v62 }
 0x3aa   : > { %4506 = vmatprep.mubr.msk.f32.mxu1 %vm5231_vm4, %v5232_v5 }
 0x3ad   : > { %4507 = vmatmul.mubr.msk.f32.gmra.mrb[4].mxu1 %vm1102_vm5, %v5541_v4 }
 0x3ae   : > { %4514 = vmatpush3.xpose.msk.msra.mxu1 %vm1102_vm5, %v1203_v22  ;;  %4515 = vmatprep.mubr.msk.f32.mxu1 %vm5231_vm4, %v5232_v5 }
 0x3af   : > { %4864 = vmatprep.subr.bf16.mxu1 %v5229_v59 }
 0x3b1   : > { %4516 = vmatmul.mubr.msk.f32.vlgmr.msra.gmra.mrb[6].mxu1 %vm1102_vm5, %v5549_v8 }
 0x3b2   : > { %4518 = vmatprep.mubr.msk.f32.mxu1 %vm5231_vm4, %v5232_v5 }
 0x3b5   : > { %4519 = vmatmul.mubr.msk.f32.gmra.mrb[8].mxu1 %vm1102_vm5, %v5551_v9 }
 0x3b6   : > { %4521 = vmatprep.mubr.msk.f32.mxu1 %vm5231_vm4, %v5232_v5 }
 0x3b9   : > { %4522 = vmatmul.mubr.msk.f32.gmra.mrb[10].mxu1 %vm1102_vm5, %v5558_v11 }
 0x3ba   : > { %4530 = vmatprep.mubr.msk.f32.mxu1 %vm5231_vm4, %v5232_v5 }
 0x478   : > { %v1181_v23 = vpop.f32.mrb[0].mxu1 }
 0x479   : > { %v4502_v24 = vpop.f32.mrb[1].mxu1  ;;  %v1296_v63 = vmul.f32 0.35355338, %v1181_v23 }
 0x47b   : > { %v1302_v3 = vsel %vm1088_vm7, %v1296_v63, -1e+30 }
 0x47c   : > { %v1186_v25 = vpop.f32.mrb[2].mxu1  ;;  %v1309_v6 = vsel %vm1308_vm8, %v1302_v3, -inf }
 0x47d   : > { %v4505_v26 = vpop.f32.mrb[3].mxu1  ;;  %v1297_v1 = vmul.f32 0.35355338, %v1186_v25 }
 0x47f   : > { %v1303_v12 = vsel %vm1088_vm7, %v1297_v1, -1e+30 }
 0x480   : > { %v1191_v28 = vpop.f32.mrb[4].mxu1  ;;  %v1312_v13 = vsel %vm1308_vm8, %v1303_v12, -inf }
 0x481   : > { %v4508_v29 = vpop.f32.mrb[5].mxu1  ;;  %v1298_v7 = vmul.f32 0.35355338, %v1191_v28 }
 0x483   : > { %v1304_v14 = vsel %vm1088_vm7, %v1298_v7, -1e+30 }
 0x484   : > { %v1282_v31 = vpop.f32.mrb[6].mxu1  ;;  %v1315_v16 = vsel %vm1308_vm8, %v1304_v14, -inf }
 0x485   : > { %v1299_v32 = vmul.f32 0.35355338, %v1282_v31  ;;  %v4517_v33 = vpop.f32.mrb[7].mxu1 }
 0x487   : > { %v1305_v34 = vsel %vm1088_vm7, %v1299_v32, -1e+30 }
 0x488   : > { %v1287_v35 = vpop.f32.mrb[8].mxu1  ;;  %v1318_v36 = vsel %vm1308_vm8, %v1305_v34, -inf }
 0x489   : > { %v1300_v37 = vmul.f32 0.35355338, %v1287_v35  ;;  %1319 = vmax.xlane.f32.xlu0 %v1318_v36  ;;  %v4520_v38 = vpop.f32.mrb[9].mxu1 }
 0x48b   : > { %v1306_v39 = vsel %vm1088_vm7, %v1300_v37, -1e+30 }
 0x48c   : > { %v1292_v40 = vpop.f32.mrb[10].mxu1  ;;  %v1321_v41 = vsel %vm1308_vm8, %v1306_v39, -inf }
 0x48d   : > { %v1301_v42 = vmul.f32 0.35355338, %v1292_v40  ;;  %1322 = vmax.xlane.f32.xlu1 %v1321_v41  ;;  %v4523_v43 = vpop.f32.mrb[11].mxu1 }
 0x48f   : > { %v1307_v44 = vsel %vm1088_vm7, %v1301_v42, -1e+30 }
 0x490   : > { %v1324_v45 = vsel %vm1308_vm8, %v1307_v44, -inf }
 0x491   : > { %1325 = vmax.xlane.f32.xlu0 %v1324_v45 }
 0x49e   : > { %1477 = vrot.lane.b32.xlu1 %v5558_v11, %s5233_s18 }
 0x4a2   : > { %5018 = vrot.lane.b32.xlu1 %v5555_v10, %s5234_s30 }
 0x4a6   : > { %1685 = vrot.lane.b32.xlu1 %v5558_v11, %s5234_s30 }
 0x516   : > { %v1320_v46 = vpop.xlane.xlu0 %1319 }
 0x517   : > { %v1330_v47 = vsub.f32 %v1305_v34, %v1320_v46 }
 0x519   : > { %v1339_v49 = vmul.f32 1.442695, %v1330_v47 }
 0x51a   : > { %v1323_v50 = vpop.xlane.xlu1 %1322 }
 0x51b   : > { %5094 = vpow2.f32 %v1339_v49  ;;  %v1331_v51 = vsub.f32 %v1306_v39, %v1323_v50 }
 0x51d   : > { %v1341_v52 = vmul.f32 1.442695, %v1331_v51 }
 0x51e   : > { %v1326_v53 = vpop.xlane.xlu0 %1325  ;;  %v1478_v17 = vpop.permute.xlu1 %1477 }
 0x51f   : > { %5096 = vpow2.f32 %v1341_v52  ;;  %v1332_v48 = vsub.f32 %v1307_v44, %v1326_v53 }
 0x521   : > { %v1343_v54 = vmul.f32 1.442695, %v1332_v48 }
 0x522   : > { %v5019_v18 = vpop.permute.xlu1 %5018 }
 0x523   : > { %5098 = vpow2.f32 %v1343_v54  ;;  %v5021_v31 = vunpack.i.h.bf16 %v5019_v18  ;;  %v5020_v32 = vunpack.i.l.bf16 %v5019_v18 }
 0x525   : > { %v5095_v55 = vpop.eup %5094  ;;  %v4875_v35 = vpack.c.bf16 %v5021_v31, %v5020_v32 }
 0x526   : > { %v1354_v57 = vsel %vm1308_vm8, %v5095_v55, 0.0  ;;  %v1686_v20 = vpop.permute.xlu1 %1685 }
 0x527   : > { %1355 = vadd.xlane.f32.xlu0 %v1354_v57 }
 0x529   : > { %v5097_v58 = vpop.eup %5096 }
 0x52a   : > { %v1357_v56 = vsel %vm1308_vm8, %v5097_v58, 0.0 }
 0x52b   : > { %1358 = vadd.xlane.f32.xlu0 %v1357_v56 }
 0x52d   : > { %v5099_v60 = vpop.eup %5098 }
 0x52e   : > { %v1360_v61 = vsel %vm1308_vm8, %v5099_v60, 0.0 }
 0x52f   : > { %1361 = vadd.xlane.f32.xlu1 %v1360_v61 }
 0x540   : > { %1677 = vrot.lane.b32.xlu1 %v5551_v9, %s5235_s20 }
 0x541   : > { %5013 = vrot.lane.b32.xlu0 %v5555_v10, %s5233_s18 }
 0x545   : > { %1675 = vrot.lane.b32.xlu0 %v5549_v8, %s5235_s20 }
 0x549   : > { %1679 = vrot.lane.b32.xlu0 %v5558_v11, %s5235_s20 }
 0x564   : > { %1310 = vmax.xlane.f32.xlu1 %v1309_v6 }
 0x568   : > { %1313 = vmax.xlane.f32.xlu0 %v1312_v13 }
 0x56c   : > { %1316 = vmax.xlane.f32.xlu0 %v1315_v16 }
 0x5b4   : > { %v1356_v19 = vpop.xlane.xlu0 %1355 }
 0x5b5   : > { %5100 = vrcp.f32 %v1356_v19 }
 0x5b8   : > { %v1359_v21 = vpop.xlane.xlu0 %1358 }
 0x5b9   : > { %5102 = vrcp.f32 %v1359_v21 }
 0x5bc   : > { %v1362_v22 = vpop.xlane.xlu1 %1361  ;;  %v5014_v23 = vpop.permute.xlu0 %5013 }
 0x5bd   : > { %v5016_v24 = vunpack.i.h.bf16 %v5014_v23  ;;  %v5015_v25 = vunpack.i.l.bf16 %v5014_v23  ;;  %5104 = vrcp.f32 %v1362_v22 }
 0x5bf   : > { %v4868_v26 = vpack.c.bf16 %v5016_v24, %v5015_v25  ;;  %v5101_v27 = vpop.eup %5100 }
 0x5c0   : > { %v1372_v28 = vmul.f32 %v5101_v27, %v5095_v55  ;;  %v1676_v37 = vpop.permute.xlu0 %1675  ;;  %v1678_v38 = vpop.permute.xlu1 %1677 }
 0x5c1   : > { %4869 = vmatpush3.bf16.msra.mxu0 %v4868_v26 }
 0x5c2   : > { %4543 = vmatprep.subr.mxu0 %v5232_v5 }
 0x5c3   : > { %v5103_v29 = vpop.eup %5102 }
 0x5c4   : > { %v1373_v33 = vmul.f32 %v5103_v29, %v5097_v58  ;;  %v1680_v39 = vpop.permute.xlu0 %1679 }
 0x5c5   : > { %4544 = vmatpush3.msra.mxu0 %v1478_v17 }
 0x5c6   : > { %4546 = vmatmul.mubr.msk.f32.vlgmr.msra.gmra.mrb[6].mxu0 %vm1308_vm8, %v1372_v28  ;;  %4874 = vmatprep.subr.bf16.mxu0 %v5229_v59 }
 0x5c7   : > { %4548 = vmatprep.mubr.msk.f32.mxu0 %vm5231_vm4, %v5232_v5  ;;  %v5105_v34 = vpop.eup %5104 }
 0x5c8   : > { %v1374_v36 = vmul.f32 %v5105_v34, %v5099_v60 }
 0x5ca   : > { %4549 = vmatmul.mubr.msk.f32.gmra.mrb[8].mxu0 %vm1308_vm8, %v1373_v33 }
 0x5cb   : > { %4551 = vmatprep.mubr.msk.f32.mxu0 %vm5231_vm4, %v5232_v5 }
 0x5cc   : > { %4877 = vmatpush3.bf16.xpose.msk.msra.mxu0 %vm5563_vm6, %v4875_v35 }
 0x5cd   : > { %4573 = vmatprep.subr.mxu0 %v5232_v5 }
 0x5ce   : > { %4552 = vmatmul.mubr.msk.f32.gmra.mrb[10].mxu0 %vm1308_vm8, %v1374_v36 }
 0x5cf   : > { %4575 = vmatprep.mubr.msk.f32.mxu0 %vm5231_vm4, %v5232_v5 }
 0x5d4   : > { %4574 = vmatpush3.xpose.msk.msra.mxu0 %vm1102_vm5, %v1686_v20 }
 0x5d5   : > { %4881 = vmatprep.subr.bf16.mxu0 %v5229_v59 }
 0x5d7   : > { %4576 = vmatmul.mubr.msk.f32.vlgmr.msra.gmra.mrb[12].mxu0 %vm1102_vm5, %v1676_v37 }
 0x5d8   : > { %4578 = vmatprep.mubr.msk.f32.mxu0 %vm5231_vm4, %v5232_v5 }
 0x5db   : > { %4579 = vmatmul.mubr.msk.f32.gmra.mrb[14].mxu0 %vm1102_vm5, %v1678_v38 }
 0x5dc   : > { %4581 = vmatprep.mubr.msk.f32.mxu0 %vm5231_vm4, %v5232_v5 }
 0x5df   : > { %4582 = vmatmul.mubr.msk.f32.gmra.mrb[16].mxu0 %vm1102_vm5, %v1680_v39 }
 0x5e0   : > { %4605 = vmatprep.mubr.msk.f32.mxu0 %vm5231_vm4, %v5232_v5 }
 0x5f1   : > { %v1311_v40 = vpop.xlane.xlu1 %1310 }
 0x5f2   : > { %v1327_v41 = vsub.f32 %v1302_v3, %v1311_v40 }
 0x5f4   : > { %v1333_v42 = vmul.f32 1.442695, %v1327_v41 }
 0x5f5   : > { %v1314_v43 = vpop.xlane.xlu0 %1313 }
 0x5f6   : > { %5106 = vpow2.f32 %v1333_v42  ;;  %v1328_v44 = vsub.f32 %v1303_v12, %v1314_v43 }
 0x5f8   : > { %v1335_v45 = vmul.f32 1.442695, %v1328_v44 }
 0x5f9   : > { %v1317_v46 = vpop.xlane.xlu0 %1316 }
 0x5fa   : > { %5108 = vpow2.f32 %v1335_v45  ;;  %v1329_v47 = vsub.f32 %v1304_v14, %v1317_v46 }
 0x5fc   : > { %v1337_v49 = vmul.f32 1.442695, %v1329_v47 }
 0x5fe   : > { %5110 = vpow2.f32 %v1337_v49 }
 0x600   : > { %v5107_v50 = vpop.eup %5106 }
 0x601   : > { %v1345_v51 = vsel %vm1308_vm8, %v5107_v50, 0.0 }
 0x602   : > { %1346 = vadd.xlane.f32.xlu0 %v1345_v51 }
 0x604   : > { %v5109_v52 = vpop.eup %5108 }
 0x605   : > { %v1348_v53 = vsel %vm1308_vm8, %v5109_v52, 0.0 }
 0x606   : > { %1349 = vadd.xlane.f32.xlu1 %v1348_v53 }
 0x608   : > { %v5111_v48 = vpop.eup %5110 }
 0x609   : > { %v1351_v54 = vsel %vm1308_vm8, %v5111_v48, 0.0 }
 0x60a   : > { %1352 = vadd.xlane.f32.xlu0 %v1351_v54 }
 0x617   : > { %5023 = vrot.lane.b32.xlu1 %v5539_v2, %s5233_s18 }
 0x61b   : > { %5028 = vrot.lane.b32.xlu1 %v5539_v2, %s5234_s30 }
 0x61f   : > { %1581 = vrot.lane.b32.xlu1 %v5541_v4, %s5234_s30 }
 0x620   : > { %1379 = vrot.lane.b32.xlu0 %v5541_v4, %s5233_s18 }
 0x623   : > { %1571 = vrot.lane.b32.xlu1 %v5535_v0, %s5235_s20 }
 0x624   : > { %1573 = vrot.lane.b32.xlu0 %v5533_v62, %s5235_s20 }
 0x627   : > { %1575 = vrot.lane.b32.xlu1 %v5541_v4, %s5235_s20  ;;  %s6362_s20 = scalar_lea.vmem %s6323_s10, %s5348_s26 }
 0x68f   : > { %v1347_v55 = vpop.xlane.xlu0 %1346 }
 0x690   : > { %5112 = vrcp.f32 %v1347_v55 }
 0x693   : > { %v1350_v57 = vpop.xlane.xlu1 %1349 }
 0x694   : > { %5114 = vrcp.f32 %v1350_v57 }
 0x697   : > { %v5024_v58 = vpop.permute.xlu1 %5023  ;;  %v1353_v56 = vpop.xlane.xlu0 %1352 }
 0x698   : > { %v5026_v60 = vunpack.i.h.bf16 %v5024_v58  ;;  %v5025_v61 = vunpack.i.l.bf16 %v5024_v58  ;;  %5116 = vrcp.f32 %v1353_v56 }
 0x699   : > { %v5681_v63 = vpop.f32.mrb[6].mxu0 }
 0x69a   : > { %v4865_v1 = vpack.c.bf16 %v5026_v60, %v5025_v61  ;;  %v4547_v3 = vpop.f32.mrb[7].mxu0  ;;  %v5113_v6 = vpop.eup %5112 }
 0x69b   : > { %v5029_v12 = vpop.permute.xlu1 %5028  ;;  %v1369_v14 = vmul.f32 %v5113_v6, %v5107_v50  ;;  %v1380_v16 = vpop.permute.xlu0 %1379 }
 0x69c   : > { %4866 = vmatpush3.bf16.msra.mxu1 %v4865_v1  ;;  %v5031_v18 = vunpack.i.h.bf16 %v5029_v12  ;;  %v5030_v19 = vunpack.i.l.bf16 %v5029_v12 }
 0x69d   : > { %v5683_v7 = vpop.f32.mrb[8].mxu0  ;;  %4528 = vmatprep.subr.mxu1 %v5232_v5 }
 0x69e   : > { %v4550_v13 = vpop.f32.mrb[9].mxu0  ;;  %v5115_v17 = vpop.eup %5114  ;;  %v4871_v24 = vpack.c.bf16 %v5031_v18, %v5030_v19 }
 0x69f   : > { %v1370_v22 = vmul.f32 %v5115_v17, %v5109_v52  ;;  %v1582_v27 = vpop.permute.xlu1 %1581  ;;  %v1574_v42 = vpop.permute.xlu0 %1573 }
 0x6a0   : > { %4529 = vmatpush3.msra.mxu1 %v1380_v16 }
 0x6a1   : > { %4531 = vmatmul.mubr.msk.f32.vlgmr.msra.gmra.mrb[12].mxu1 %vm1308_vm8, %v1369_v14  ;;  %v5687_v20 = vpop.f32.mrb[10].mxu0  ;;  %4870 = vmatprep.subr.bf16.mxu1 %v5229_v59 }
 0x6a2   : > { %v4553_v21 = vpop.f32.mrb[11].mxu0  ;;  %4533 = vmatprep.mubr.msk.f32.mxu1 %vm5231_vm4, %v5232_v5  ;;  %v5117_v23 = vpop.eup %5116 }
 0x6a3   : > { %v1371_v25 = vmul.f32 %v5117_v23, %v5111_v48  ;;  %v1572_v36 = vpop.permute.xlu1 %1571 }
 0x6a5   : > { %4534 = vmatmul.mubr.msk.f32.gmra.mrb[14].mxu1 %vm1308_vm8, %v1370_v22 }
 0x6a6   : > { %4536 = vmatprep.mubr.msk.f32.mxu1 %vm5231_vm4, %v5232_v5 }
 0x6a7   : > { %4873 = vmatpush3.bf16.xpose.msk.msra.mxu1 %vm5563_vm6, %v4871_v24  ;;  %v1576_v45 = vpop.permute.xlu1 %1575 }
 0x6a8   : > { %4558 = vmatprep.subr.mxu1 %v5232_v5 }
 0x6a9   : > { %4537 = vmatmul.mubr.msk.f32.gmra.mrb[16].mxu1 %vm1308_vm8, %v1371_v25 }
 0x6aa   : > { %v1765_v26 = vpop.f32.mrb[12].mxu0  ;;  %4560 = vmatprep.mubr.msk.f32.mxu1 %vm5231_vm4, %v5232_v5 }
 0x6ab   : > { %v1782_v28 = vmul.f32 0.35355338, %v1765_v26  ;;  %v4577_v29 = vpop.f32.mrb[13].mxu0 }
 0x6ad   : > { %v1788_v31 = vsel %vm1088_vm7, %v1782_v28, -1e+30 }
 0x6ae   : > { %v1770_v32 = vpop.f32.mrb[14].mxu0  ;;  %v1800_v33 = vsel %vm1308_vm8, %v1788_v31, -inf }
 0x6af   : > { %v1783_v34 = vmul.f32 0.35355338, %v1770_v32  ;;  %4559 = vmatpush3.xpose.msk.msra.mxu1 %vm1102_vm5, %v1582_v27  ;;  %1801 = vmax.xlane.f32.xlu0 %v1800_v33  ;;  %v4580_v35 = vpop.f32.mrb[15].mxu0 }
 0x6b0   : > { %4878 = vmatprep.subr.bf16.mxu1 %v5229_v59 }
 0x6b1   : > { %v1789_v37 = vsel %vm1088_vm7, %v1783_v34, -1e+30 }
 0x6b2   : > { %4561 = vmatmul.mubr.msk.f32.vlgmr.msra.gmra.mrb[18].mxu1 %vm1102_vm5, %v1572_v36  ;;  %v1775_v38 = vpop.f32.mrb[16].mxu0  ;;  %v1803_v39 = vsel %vm1308_vm8, %v1789_v37, -inf }
 0x6b3   : > { %v1784_v40 = vmul.f32 0.35355338, %v1775_v38  ;;  %1804 = vmax.xlane.f32.xlu1 %v1803_v39  ;;  %v4583_v41 = vpop.f32.mrb[17].mxu0  ;;  %4563 = vmatprep.mubr.msk.f32.mxu1 %vm5231_vm4, %v5232_v5 }
 0x6b5   : > { %v1790_v43 = vsel %vm1088_vm7, %v1784_v40, -1e+30 }
 0x6b6   : > { %4564 = vmatmul.mubr.msk.f32.gmra.mrb[20].mxu1 %vm1102_vm5, %v1574_v42  ;;  %v1806_v44 = vsel %vm1308_vm8, %v1790_v43, -inf }
 0x6b7   : > { %1807 = vmax.xlane.f32.xlu0 %v1806_v44  ;;  %4566 = vmatprep.mubr.msk.f32.mxu1 %vm5231_vm4, %v5232_v5 }
 0x6ba   : > { %4567 = vmatmul.mubr.msk.f32.gmra.mrb[22].mxu1 %vm1102_vm5, %v1576_v45 }
 0x6bb   : > { %4590 = vmatprep.mubr.msk.f32.mxu1 %vm5231_vm4, %v5232_v5 }
 0x6c4   : > { %1959 = vrot.lane.b32.xlu1 %v5558_v11, %s5236_s19 }
 0x6c8   : > { %5038 = vrot.lane.b32.xlu1 %v5539_v2, %s5237_s24 }
 0x6cc   : > { %2289 = vrot.lane.b32.xlu1 %v5541_v4, %s5237_s24 }
 0x73c   : > { %v1802_v46 = vpop.xlane.xlu0 %1801 }
 0x73d   : > { %v1812_v47 = vsub.f32 %v1788_v31, %v1802_v46 }
 0x73f   : > { %v1821_v49 = vmul.f32 1.442695, %v1812_v47 }
 0x740   : > { %v1805_v50 = vpop.xlane.xlu1 %1804 }
 0x741   : > { %5118 = vpow2.f32 %v1821_v49  ;;  %v1813_v51 = vsub.f32 %v1789_v37, %v1805_v50 }
 0x743   : > { %v1823_v52 = vmul.f32 1.442695, %v1813_v51 }
 0x744   : > { %v1808_v53 = vpop.xlane.xlu0 %1807  ;;  %v1960_v33 = vpop.permute.xlu1 %1959 }
 0x745   : > { %5120 = vpow2.f32 %v1823_v52  ;;  %v1814_v48 = vsub.f32 %v1790_v43, %v1808_v53 }
 0x747   : > { %v1825_v54 = vmul.f32 1.442695, %v1814_v48 }
 0x748   : > { %v5039_v34 = vpop.permute.xlu1 %5038 }
 0x749   : > { %5122 = vpow2.f32 %v1825_v54  ;;  %v5041_v46 = vunpack.i.h.bf16 %v5039_v34  ;;  %v5040_v47 = vunpack.i.l.bf16 %v5039_v34 }
 0x74b   : > { %v5119_v55 = vpop.eup %5118  ;;  %v4885_v51 = vpack.c.bf16 %v5041_v46, %v5040_v47 }
 0x74c   : > { %v1836_v57 = vsel %vm1308_vm8, %v5119_v55, 0.0  ;;  %v2290_v36 = vpop.permute.xlu1 %2289 }
 0x74d   : > { %1837 = vadd.xlane.f32.xlu0 %v1836_v57 }
 0x74f   : > { %v5728_v58 = vpop.eup %5120 }
 0x750   : > { %v1839_v56 = vsel %vm1308_vm8, %v5728_v58, 0.0 }
 0x751   : > { %1840 = vadd.xlane.f32.xlu0 %v1839_v56 }
 0x753   : > { %v5732_v60 = vpop.eup %5122 }
 0x754   : > { %v1842_v61 = vsel %vm1308_vm8, %v5732_v60, 0.0 }
 0x755   : > { %1843 = vadd.xlane.f32.xlu1 %v1842_v61 }
 0x766   : > { %2279 = vrot.lane.b32.xlu1 %v5535_v0, %s5238_s28 }
 0x767   : > { %5033 = vrot.lane.b32.xlu0 %v5555_v10, %s5236_s19 }
 0x76a   : > { %2283 = vrot.lane.b32.xlu1 %v5541_v4, %s5238_s28 }
 0x76b   : > { %5043 = vrot.lane.b32.xlu0 %v5555_v10, %s5237_s24 }
 0x76e   : > { %2383 = vrot.lane.b32.xlu1 %v5549_v8, %s5238_s28 }
 0x76f   : > { %2281 = vrot.lane.b32.xlu0 %v5533_v62, %s5238_s28 }
 0x772   : > { %2387 = vrot.lane.b32.xlu1 %v5558_v11, %s5238_s28 }
 0x773   : > { %2393 = vrot.lane.b32.xlu0 %v5558_v11, %s5237_s24 }
 0x774   : > { %v5747_v1 = vpop.f32.mrb[12].mxu1 }
 0x775   : > { %v4532_v3 = vpop.f32.mrb[13].mxu1 }
 0x777   : > { %2385 = vrot.lane.b32.xlu0 %v5551_v9, %s5238_s28 }
 0x778   : > { %v5750_v6 = vpop.f32.mrb[14].mxu1 }
 0x779   : > { %v4535_v12 = vpop.f32.mrb[15].mxu1 }
 0x77c   : > { %v5752_v13 = vpop.f32.mrb[16].mxu1 }
 0x77d   : > { %v4538_v14 = vpop.f32.mrb[17].mxu1 }
 0x785   : > { %v1661_v16 = vpop.f32.mrb[18].mxu1 }
 0x786   : > { %v4562_v17 = vpop.f32.mrb[19].mxu1  ;;  %v1779_v22 = vmul.f32 0.35355338, %v1661_v16 }
 0x788   : > { %v5756_v26 = vsel %vm1088_vm7, %v1779_v22, -1e+30 }
 0x789   : > { %v1666_v18 = vpop.f32.mrb[20].mxu1  ;;  %v1791_v28 = vsel %vm1308_vm8, %v5756_v26, -inf }
 0x78a   : > { %v4565_v19 = vpop.f32.mrb[21].mxu1  ;;  %v1780_v23 = vmul.f32 0.35355338, %v1666_v18 }
 0x78c   : > { %v5760_v27 = vsel %vm1088_vm7, %v1780_v23, -1e+30 }
 0x78d   : > { %v1671_v21 = vpop.f32.mrb[22].mxu1  ;;  %v1794_v29 = vsel %vm1308_vm8, %v5760_v27, -inf }
 0x78e   : > { %v4568_v24 = vpop.f32.mrb[23].mxu1  ;;  %v1781_v25 = vmul.f32 0.35355338, %v1671_v21 }
 0x790   : > { %v5768_v31 = vsel %vm1088_vm7, %v1781_v25, -1e+30 }
 0x791   : > { %v1797_v32 = vsel %vm1308_vm8, %v5768_v31, -inf }
 0x796   : > { %1792 = vmax.xlane.f32.xlu0 %v1791_v28  ;;  %1795 = vmax.xlane.f32.xlu1 %v1794_v29 }
 0x79a   : > { %1798 = vmax.xlane.f32.xlu0 %v1797_v32 }
 0x7da   : > { %v1838_v35 = vpop.xlane.xlu0 %1837 }
 0x7db   : > { %5124 = vrcp.f32 %v1838_v35 }
 0x7de   : > { %v1841_v37 = vpop.xlane.xlu0 %1840 }
 0x7df   : > { %5126 = vrcp.f32 %v1841_v37 }
 0x7e2   : > { %v1844_v38 = vpop.xlane.xlu1 %1843  ;;  %v5034_v39 = vpop.permute.xlu0 %5033 }
 0x7e3   : > { %v5036_v40 = vunpack.i.h.bf16 %v5034_v39  ;;  %v5035_v41 = vunpack.i.l.bf16 %v5034_v39  ;;  %5128 = vrcp.f32 %v1844_v38 }
 0x7e5   : > { %v4882_v42 = vpack.c.bf16 %v5036_v40, %v5035_v41  ;;  %v5125_v43 = vpop.eup %5124 }
 0x7e6   : > { %v1854_v44 = vmul.f32 %v5125_v43, %v5119_v55  ;;  %v5044_v53 = vpop.permute.xlu0 %5043  ;;  %v2280_v55 = vpop.permute.xlu1 %2279 }
 0x7e7   : > { %4883 = vmatpush3.bf16.msra.mxu0 %v4882_v42  ;;  %v5046_v48 = vunpack.i.h.bf16 %v5044_v53  ;;  %v5045_v54 = vunpack.i.l.bf16 %v5044_v53 }
 0x7e8   : > { %4603 = vmatprep.subr.mxu0 %v5232_v5 }
 0x7e9   : > { %v5127_v45 = vpop.eup %5126  ;;  %v4889_v57 = vpack.c.bf16 %v5046_v48, %v5045_v54 }
 0x7ea   : > { %v1855_v49 = vmul.f32 %v5127_v45, %v5728_v58  ;;  %v2282_v58 = vpop.permute.xlu0 %2281  ;;  %v2284_v56 = vpop.permute.xlu1 %2283 }
 0x7eb   : > { %4604 = vmatpush3.msra.mxu0 %v1960_v33 }
 0x7ec   : > { %4606 = vmatmul.mubr.msk.f32.vlgmr.msra.gmra.mrb[18].mxu0 %vm1308_vm8, %v1854_v44  ;;  %4884 = vmatprep.subr.bf16.mxu0 %v5229_v59 }
 0x7ed   : > { %4608 = vmatprep.mubr.msk.f32.mxu0 %vm5231_vm4, %v5232_v5  ;;  %v5129_v50 = vpop.eup %5128 }
 0x7ee   : > { %v1856_v52 = vmul.f32 %v5129_v50, %v5732_v60  ;;  %v2394_v60 = vpop.permute.xlu0 %2393  ;;  %v2384_v61 = vpop.permute.xlu1 %2383 }
 0x7f0   : > { %4609 = vmatmul.mubr.msk.f32.gmra.mrb[20].mxu0 %vm1308_vm8, %v1855_v49 }
 0x7f1   : > { %4611 = vmatprep.mubr.msk.f32.mxu0 %vm5231_vm4, %v5232_v5 }
 0x7f2   : > { %4887 = vmatpush3.bf16.xpose.msk.msra.mxu0 %vm5563_vm6, %v4885_v51  ;;  %v2386_v3 = vpop.permute.xlu0 %2385  ;;  %v2388_v12 = vpop.permute.xlu1 %2387 }
 0x7f3   : > { %4640 = vmatprep.subr.mxu0 %v5232_v5 }
 0x7f4   : > { %4612 = vmatmul.mubr.msk.f32.gmra.mrb[22].mxu0 %vm1308_vm8, %v1856_v52 }
 0x7f5   : > { %4642 = vmatprep.mubr.msk.f32.mxu0 %vm5231_vm4, %v5232_v5 }
 0x7fa   : > { %4641 = vmatpush3.xpose.msk.msra.mxu0 %vm1102_vm5, %v2290_v36 }
 0x7fb   : > { %4888 = vmatprep.subr.bf16.mxu0 %v5229_v59 }
 0x7fd   : > { %4643 = vmatmul.mubr.msk.f32.vlgmr.msra.gmra.mrb[24].mxu0 %vm1102_vm5, %v2280_v55 }
 0x7fe   : > { %4891 = vmatpush3.bf16.xpose.msk.msra.mxu0 %vm5563_vm6, %v4889_v57  ;;  %4645 = vmatprep.mubr.msk.f32.mxu0 %vm5231_vm4, %v5232_v5 }
 0x7ff   : > { %4655 = vmatprep.subr.mxu0 %v5232_v5 }
 0x801   : > { %4646 = vmatmul.mubr.msk.f32.gmra.mrb[26].mxu0 %vm1102_vm5, %v2282_v58 }
 0x802   : > { %4648 = vmatprep.mubr.msk.f32.mxu0 %vm5231_vm4, %v5232_v5 }
 0x805   : > { %4649 = vmatmul.mubr.msk.f32.gmra.mrb[28].mxu0 %vm1102_vm5, %v2284_v56 }
 0x806   : > { %4656 = vmatpush3.xpose.msk.msra.mxu0 %vm1102_vm5, %v2394_v60  ;;  %4657 = vmatprep.mubr.msk.f32.mxu0 %vm5231_vm4, %v5232_v5 }
 0x807   : > { %4895 = vmatprep.subr.bf16.mxu0 %v5229_v59 }
 0x809   : > { %4658 = vmatmul.mubr.msk.f32.vlgmr.msra.gmra.mrb[30].mxu0 %vm1102_vm5, %v2384_v61 }
 0x80a   : > { %4660 = vmatprep.mubr.msk.f32.mxu0 %vm5231_vm4, %v5232_v5 }
 0x80d   : > { %4661 = vmatmul.mubr.msk.f32.gmra.mrb[32].mxu0 %vm1102_vm5, %v2386_v3 }
 0x80e   : > { %4663 = vmatprep.mubr.msk.f32.mxu0 %vm5231_vm4, %v5232_v5 }
 0x811   : > { %4664 = vmatmul.mubr.msk.f32.gmra.mrb[34].mxu0 %vm1102_vm5, %v2388_v12 }
 0x812   : > { %4687 = vmatprep.mubr.msk.f32.mxu0 %vm5231_vm4, %v5232_v5 }
 0x823   : > { %v1793_v14 = vpop.xlane.xlu0 %1792  ;;  %v1796_v16 = vpop.xlane.xlu1 %1795 }
 0x824   : > { %v1809_v17 = vsub.f32 %v5756_v26, %v1793_v14  ;;  %v1810_v18 = vsub.f32 %v5760_v27, %v1796_v16 }
 0x826   : > { %v1815_v19 = vmul.f32 1.442695, %v1809_v17  ;;  %v1817_v21 = vmul.f32 1.442695, %v1810_v18 }
 0x827   : > { %v1799_v22 = vpop.xlane.xlu0 %1798 }
 0x828   : > { %5130 = vpow2.f32 %v1815_v19  ;;  %v1811_v23 = vsub.f32 %v5768_v31, %v1799_v22 }
 0x829   : > { %5132 = vpow2.f32 %v1817_v21 }
 0x82a   : > { %v1819_v24 = vmul.f32 1.442695, %v1811_v23 }
 0x82c   : > { %5134 = vpow2.f32 %v1819_v24 }
 0x832   : > { %v5131_v25 = vpop.eup %5130 }
 0x833   : > { %v1827_v28 = vsel %vm1308_vm8, %v5131_v25, 0.0  ;;  %v5133_v29 = vpop.eup %5132 }
 0x834   : > { %1828 = vadd.xlane.f32.xlu0 %v1827_v28  ;;  %v1830_v33 = vsel %vm1308_vm8, %v5133_v29, 0.0 }
 0x836   : > { %v5135_v32 = vpop.eup %5134 }
 0x837   : > { %v1833_v26 = vsel %vm1308_vm8, %v5135_v32, 0.0 }
 0x838   : > { %1831 = vadd.xlane.f32.xlu0 %v1830_v33  ;;  %1834 = vadd.xlane.f32.xlu1 %v1833_v26 }
 0x849   : > { %1861 = vrot.lane.b32.xlu1 %v5541_v4, %s5236_s19 }
 0x84e   : > { %5048 = vrot.lane.b32.xlu0 %v5539_v2, %s5236_s19 }
 0x8bf   : > { %v5823_v27 = vpop.f32.mrb[18].mxu0 }
 0x8c0   : > { %v4607_v31 = vpop.f32.mrb[19].mxu0 }
 0x8c1   : > { %v1829_v34 = vpop.xlane.xlu0 %1828 }
 0x8c2   : > { %5136 = vrcp.f32 %v1829_v34 }
 0x8c3   : > { %v5825_v35 = vpop.f32.mrb[20].mxu0 }
 0x8c4   : > { %v4610_v36 = vpop.f32.mrb[21].mxu0 }
 0x8c5   : > { %v1832_v37 = vpop.xlane.xlu0 %1831  ;;  %v1835_v40 = vpop.xlane.xlu1 %1834 }
 0x8c6   : > { %5138 = vrcp.f32 %v1832_v37 }
 0x8c7   : > { %v5827_v38 = vpop.f32.mrb[22].mxu0  ;;  %5140 = vrcp.f32 %v1835_v40  ;;  %v1089_v40 = vld [vmem:[%s6361_s17] sm:$0xff] }
 0x8c8   : > { %v4613_v39 = vpop.f32.mrb[23].mxu0 }
 0x8c9   : > { %v5049_v41 = vpop.permute.xlu0 %5048  ;;  %v1862_v49 = vpop.permute.xlu1 %1861  ;;  %v1090_v39 = vld [vmem:[%s6361_s17 + $0x8] sm:$0xff] }
 0x8ca   : > { %v5051_v42 = vunpack.i.h.bf16 %v5049_v41  ;;  %v5050_v43 = vunpack.i.l.bf16 %v5049_v41 }
 0x8cc   : > { %v4879_v44 = vpack.c.bf16 %v5051_v42, %v5050_v43  ;;  %v5137_v45 = vpop.eup %5136 }
 0x8cd   : > { %v1851_v47 = vmul.f32 %v5137_v45, %v5131_v25 }
 0x8ce   : > { %4880 = vmatpush3.bf16.msra.mxu1 %v4879_v44 }
 0x8cf   : > { %4588 = vmatprep.subr.mxu1 %v5232_v5 }
 0x8d0   : > { %v2369_v46 = vpop.f32.mrb[24].mxu0  ;;  %v5139_v52 = vpop.eup %5138 }
 0x8d1   : > { %v2487_v50 = vmul.f32 0.35355338, %v2369_v46  ;;  %v4644_v51 = vpop.f32.mrb[25].mxu0  ;;  %v1852_v58 = vmul.f32 %v5139_v52, %v5133_v29  ;;  %v5141_v56 = vpop.eup %5140 }
 0x8d2   : > { %4589 = vmatpush3.msra.mxu1 %v1862_v49  ;;  %v1853_v16 = vmul.f32 %v5141_v56, %v5135_v32 }
 0x8d3   : > { %4591 = vmatmul.mubr.msk.f32.vlgmr.msra.gmra.mrb[24].mxu1 %vm1308_vm8, %v1851_v47  ;;  %v2493_v53 = vsel %vm1088_vm7, %v2487_v50, -1e+30  ;;  %4614 = vmatprep.subr.mxu1 %v1090_v39 }
 0x8d4   : > { %v2374_v48 = vpop.f32.mrb[26].mxu0  ;;  %v2499_v54 = vsel %vm1308_vm8, %v2493_v53, -inf  ;;  %4593 = vmatprep.mubr.msk.f32.mxu1 %vm5231_vm4, %v5232_v5  ;;  %4615 = vmatpush3.msra.mxu1 %v1090_v39 }
 0x8d5   : > { %v2488_v55 = vmul.f32 0.35355338, %v2374_v48  ;;  %v4647_v57 = vpop.f32.mrb[27].mxu0  ;;  %2500 = vmax.xlane.f32.xlu1 %v2499_v54  ;;  %4625 = vmatprep.subr.mxu1 %v1089_v40 }
 0x8d7   : > { %4594 = vmatmul.mubr.msk.f32.gmra.mrb[26].mxu1 %vm1308_vm8, %v1852_v58  ;;  %v2494_v60 = vsel %vm1088_vm7, %v2488_v55, -1e+30 }
 0x8d8   : > { %v2379_v61 = vpop.f32.mrb[28].mxu0  ;;  %v2502_v3 = vsel %vm1308_vm8, %v2494_v60, -inf  ;;  %4596 = vmatprep.mubr.msk.f32.mxu1 %vm5231_vm4, %v5232_v5 }
 0x8d9   : > { %v2489_v12 = vmul.f32 0.35355338, %v2379_v61  ;;  %v4650_v14 = vpop.f32.mrb[29].mxu0  ;;  %2503 = vmax.xlane.f32.xlu0 %v2502_v3 }
 0x8db   : > { %4597 = vmatmul.mubr.msk.f32.gmra.mrb[28].mxu1 %vm1308_vm8, %v1853_v16  ;;  %v2495_v17 = vsel %vm1088_vm7, %v2489_v12, -1e+30 }
 0x8dc   : > { %v2473_v18 = vpop.f32.mrb[30].mxu0  ;;  %v2505_v19 = vsel %vm1308_vm8, %v2495_v17, -inf }
 0x8dd   : > { %v2490_v21 = vmul.f32 0.35355338, %v2473_v18  ;;  %v4659_v22 = vpop.f32.mrb[31].mxu0  ;;  %2506 = vmax.xlane.f32.xlu1 %v2505_v19 }
 0x8df   : > { %v2496_v23 = vsel %vm1088_vm7, %v2490_v21, -1e+30 }
 0x8e0   : > { %v2478_v24 = vpop.f32.mrb[32].mxu0  ;;  %v2508_v25 = vsel %vm1308_vm8, %v2496_v23, -inf }
 0x8e1   : > { %v2491_v28 = vmul.f32 0.35355338, %v2478_v24  ;;  %v4662_v29 = vpop.f32.mrb[33].mxu0  ;;  %2509 = vmax.xlane.f32.xlu0 %v2508_v25 }
 0x8e3   : > { %v2497_v32 = vsel %vm1088_vm7, %v2491_v28, -1e+30 }
 0x8e4   : > { %v2483_v33 = vpop.f32.mrb[34].mxu0  ;;  %v2511_v26 = vsel %vm1308_vm8, %v2497_v32, -inf }
 0x8e5   : > { %v2492_v31 = vmul.f32 0.35355338, %v2483_v33  ;;  %v4665_v34 = vpop.f32.mrb[35].mxu0  ;;  %2512 = vmax.xlane.f32.xlu0 %v2511_v26 }
 0x8e7   : > { %v2498_v36 = vsel %vm1088_vm7, %v2492_v31, -1e+30  ;;  %v1091_v31 = vld [vmem:[%s6361_s17 + $0x10] sm:$0xff] }
 0x8e8   : > { %v2514_v37 = vsel %vm1308_vm8, %v2498_v36, -inf }
 0x8e9   : > { %2515 = vmax.xlane.f32.xlu1 %v2514_v37 }
 0x962   : > { %v2501_v41 = vpop.xlane.xlu1 %2500 }
 0x963   : > { %v2517_v42 = vsub.f32 %v2493_v53, %v2501_v41 }
 0x965   : > { %v2523_v43 = vmul.f32 1.442695, %v2517_v42 }
 0x966   : > { %v2504_v44 = vpop.xlane.xlu0 %2503 }
 0x967   : > { %5142 = vpow2.f32 %v2523_v43  ;;  %v2518_v45 = vsub.f32 %v2494_v60, %v2504_v44 }
 0x969   : > { %v2525_v46 = vmul.f32 1.442695, %v2518_v45 }
 0x96a   : > { %v2507_v47 = vpop.xlane.xlu1 %2506 }
 0x96b   : > { %5144 = vpow2.f32 %v2525_v46  ;;  %v2519_v49 = vsub.f32 %v2495_v17, %v2507_v47 }
 0x96d   : > { %v2527_v50 = vmul.f32 1.442695, %v2519_v49 }
 0x96e   : > { %v2510_v51 = vpop.xlane.xlu0 %2509 }
 0x96f   : > { %5146 = vpow2.f32 %v2527_v50  ;;  %v2520_v52 = vsub.f32 %v2496_v23, %v2510_v51 }
 0x971   : > { %v5857_v48 = vpop.eup %5142  ;;  %v2529_v54 = vmul.f32 1.442695, %v2520_v52 }
 0x972   : > { %v2513_v55 = vpop.xlane.xlu0 %2512  ;;  %v2535_v57 = vsel %vm1308_vm8, %v5857_v48, 0.0 }
 0x973   : > { %5148 = vpow2.f32 %v2529_v54  ;;  %v2521_v53 = vsub.f32 %v2497_v32, %v2513_v55  ;;  %2536 = vadd.xlane.f32.xlu0 %v2535_v57 }
 0x975   : > { %v5861_v58 = vpop.eup %5144  ;;  %v2531_v56 = vmul.f32 1.442695, %v2521_v53 }
 0x976   : > { %v2538_v60 = vsel %vm1308_vm8, %v5861_v58, 0.0  ;;  %v2516_v18 = vpop.xlane.xlu1 %2515 }
 0x977   : > { %5150 = vpow2.f32 %v2531_v56  ;;  %2539 = vadd.xlane.f32.xlu1 %v2538_v60  ;;  %v2522_v19 = vsub.f32 %v2498_v36, %v2516_v18 }
 0x979   : > { %v5865_v61 = vpop.eup %5146  ;;  %v2533_v21 = vmul.f32 1.442695, %v2522_v19 }
 0x97a   : > { %v2541_v3 = vsel %vm1308_vm8, %v5865_v61, 0.0 }
 0x97b   : > { %2542 = vadd.xlane.f32.xlu1 %v2541_v3  ;;  %5152 = vpow2.f32 %v2533_v21 }
 0x97d   : > { %v5869_v12 = vpop.eup %5148 }
 0x97e   : > { %v2544_v14 = vsel %vm1308_vm8, %v5869_v12, 0.0 }
 0x97f   : > { %2545 = vadd.xlane.f32.xlu0 %v2544_v14 }
 0x981   : > { %v5873_v16 = vpop.eup %5150 }
 0x982   : > { %v2547_v17 = vsel %vm1308_vm8, %v5873_v16, 0.0 }
 0x983   : > { %2548 = vadd.xlane.f32.xlu0 %v2547_v17 }
 0x985   : > { %v5895_v32 = vpop.eup %5152 }
 0x98c   : > { %5058 = vrot.lane.b32.xlu1 %v5555_v10, %s5239_s5 }
 0x990   : > { %2569 = vrot.lane.b32.xlu1 %v5541_v4, %s5239_s5 }
 0x999   : > { %5053 = vrot.lane.b32.xlu0 %v5539_v2, %s5239_s5 }
 0x99d   : > { %5063 = vrot.lane.b32.xlu0 %v5539_v2, %s5240_s9 }
 0x9a1   : > { %2890 = vrot.lane.b32.xlu0 %v5541_v4, %s5240_s9 }
 0x9a5   : > { %2994 = vrot.lane.b32.xlu0 %v5558_v11, %s5240_s9 }
 0x9a6   : > { %v1941_v22 = vpop.f32.mrb[24].mxu1 }
 0x9a7   : > { %v4592_v23 = vpop.f32.mrb[25].mxu1  ;;  %4616 = vmatprep.mubr.msk.f32.mxu1 %vm1102_vm5, %v1941_v22 }
 0x9a9   : > { %2984 = vrot.lane.b32.xlu0 %v5549_v8, %s5241_s29  ;;  %v2550_v8 = vsel %vm1308_vm8, %v5895_v32, 0.0 }
 0x9aa   : > { %v1946_v24 = vpop.f32.mrb[26].mxu1 }
 0x9ab   : > { %v4595_v25 = vpop.f32.mrb[27].mxu1  ;;  %4617 = vmatmul.mubr.msk.f32.vlgmr.msra.gmra.mrb[30].mxu1 %vm1102_vm5, %v1946_v24 }
 0x9ac   : > { %4626 = vmatpush3.msra.mxu1 %v1089_v40 }
 0x9ad   : > { %2986 = vrot.lane.b32.xlu0 %v5551_v9, %s5241_s29  ;;  %4892 = vmatprep.subr.bf16.mxu1 %v5229_v59 }
 0x9ae   : > { %v1951_v28 = vpop.f32.mrb[28].mxu1 }
 0x9af   : > { %v4598_v29 = vpop.f32.mrb[29].mxu1  ;;  %4619 = vmatprep.mubr.msk.f32.mxu1 %vm1102_vm5, %v1951_v28 }
 0x9b0   : > { %4620 = vmatmul.mubr.msk.f32.gmra.mrb[32].mxu1 %vm1102_vm5, %v5823_v27 }
 0x9b1   : > { %4622 = vmatprep.mubr.msk.f32.mxu1 %vm1102_vm5, %v5825_v35 }
 0x9b4   : > { %2551 = vadd.xlane.f32.xlu1 %v2550_v8  ;;  %4623 = vmatmul.mubr.msk.f32.gmra.mrb[34].mxu1 %vm1102_vm5, %v5827_v38 }
 0x9b5   : > { %4627 = vmatprep.mubr.msk.f32.mxu1 %vm1102_vm5, %v5747_v1 }
 0x9b8   : > { %4628 = vmatmul.mubr.msk.f32.vlgmr.msra.gmra.mrb[30].mxu1 %vm1102_vm5, %v5750_v6 }
 0x9b9   : > { %4630 = vmatprep.mubr.msk.f32.mxu1 %vm1102_vm5, %v5752_v13 }
 0x9bc   : > { %4631 = vmatmul.mubr.msk.f32.gmra.mrb[32].mxu1 %vm1102_vm5, %v5681_v63 }
 0x9bd   : > { %4633 = vmatprep.mubr.msk.f32.mxu1 %vm1102_vm5, %v5683_v7 }
 0x9c0   : > { %4634 = vmatmul.mubr.msk.f32.gmra.mrb[34].mxu1 %vm1102_vm5, %v5687_v20 }
 0x9c1   : > { %4672 = vmatprep.mubr.msk.f32.mxu1 %vm5231_vm4, %v5232_v5 }
 0x9c5   : > { %2667 = vrot.lane.b32.xlu1 %v5558_v11, %s5239_s5 }
 0x9c9   : > { %5068 = vrot.lane.b32.xlu1 %v5555_v10, %s5240_s9  ;;  %s6364_s9 = sld [smem:[#allocation11_spill]] (!%p4273_p5) }
 0x9cd   : > { %2880 = vrot.lane.b32.xlu1 %v5535_v0, %s5241_s29 }
 0x9d1   : > { %2882 = vrot.lane.b32.xlu1 %v5533_v62, %s5241_s29 }
 0x9d5   : > { %2884 = vrot.lane.b32.xlu1 %v5541_v4, %s5241_s29 }
 0x9d9   : > { %2988 = vrot.lane.b32.xlu1 %v5558_v11, %s5241_s29 }
 0xa00   : > { %v2537_v63 = vpop.xlane.xlu0 %2536 }
 0xa01   : > { %5154 = vrcp.f32 %v2537_v63 }
 0xa04   : > { %v2540_v9 = vpop.xlane.xlu1 %2539 }
 0xa05   : > { %5156 = vrcp.f32 %v2540_v9 }
 0xa08   : > { %v2543_v7 = vpop.xlane.xlu1 %2542 }
 0xa09   : > { %5158 = vrcp.f32 %v2543_v7 }
 0xa0b   : > { %v5155_v26 = vpop.eup %5154 }
 0xa0c   : > { %v5059_v20 = vpop.permute.xlu1 %5058  ;;  %v2546_v1 = vpop.xlane.xlu0 %2545  ;;  %v2559_v34 = vmul.f32 %v5155_v26, %v5857_v48 }
 0xa0d   : > { %v5061_v6 = vunpack.i.h.bf16 %v5059_v20  ;;  %v5060_v13 = vunpack.i.l.bf16 %v5059_v20  ;;  %5160 = vrcp.f32 %v2546_v1 }
 0xa0f   : > { %v4896_v27 = vpack.c.bf16 %v5061_v6, %v5060_v13  ;;  %v5157_v37 = vpop.eup %5156 }
 0xa10   : > { %v2549_v35 = vpop.xlane.xlu0 %2548  ;;  %v2570_v36 = vpop.permute.xlu1 %2569  ;;  %v2560_v39 = vmul.f32 %v5157_v37, %v5861_v58 }
 0xa11   : > { %4897 = vmatpush3.bf16.msra.mxu0 %v4896_v27  ;;  %5162 = vrcp.f32 %v2549_v35 }
 0xa12   : > { %4685 = vmatprep.subr.mxu0 %v5232_v5 }
 0xa13   : > { %v5159_v40 = vpop.eup %5158 }
 0xa14   : > { %v5054_v62 = vpop.permute.xlu0 %5053  ;;  %v2561_v41 = vmul.f32 %v5159_v40, %v5865_v61 }
 0xa15   : > { %v5056_v0 = vunpack.i.h.bf16 %v5054_v62  ;;  %v5055_v38 = vunpack.i.l.bf16 %v5054_v62 }
 0xa17   : > { %v4893_v33 = vpack.c.bf16 %v5056_v0, %v5055_v38  ;;  %v5161_v43 = vpop.eup %5160 }
 0xa18   : > { %v5064_v44 = vpop.permute.xlu0 %5063  ;;  %v2562_v45 = vmul.f32 %v5161_v43, %v5869_v12 }
 0xa19   : > { %4894 = vmatpush3.bf16.msra.mxu1 %v4893_v33  ;;  %v5066_v49 = vunpack.i.h.bf16 %v5064_v44  ;;  %v5065_v50 = vunpack.i.l.bf16 %v5064_v44 }
 0xa1a   : > { %4670 = vmatprep.subr.mxu1 %v5232_v5 }
 0xa1b   : > { %v5163_v47 = vpop.eup %5162  ;;  %v4899_v52 = vpack.c.bf16 %v5066_v49, %v5065_v50 }
 0xa1c   : > { %v2563_v51 = vmul.f32 %v5163_v47, %v5873_v16  ;;  %v2891_v53 = vpop.permute.xlu0 %2890 }
 0xa1d   : > { %4671 = vmatpush3.msra.mxu1 %v2570_v36 }
 0xa1e   : > { %4673 = vmatmul.mubr.msk.f32.vlgmr.msra.gmra.mrb[36].mxu1 %vm1308_vm8, %v2559_v34  ;;  %4696 = vmatprep.subr.mxu1 %v1091_v31 }
 0xa1f   : > { %4675 = vmatprep.mubr.msk.f32.mxu1 %vm5231_vm4, %v5232_v5  ;;  %4697 = vmatpush3.msra.mxu1 %v1091_v31 }
 0xa20   : > { %4902 = vmatprep.subr.bf16.mxu1 %v5229_v59  ;;  %v2995_v21 = vpop.permute.xlu0 %2994 }
 0xa22   : > { %4676 = vmatmul.mubr.msk.f32.gmra.mrb[38].mxu1 %vm1308_vm8, %v2560_v39 }
 0xa23   : > { %4678 = vmatprep.mubr.msk.f32.mxu1 %vm5231_vm4, %v5232_v5 }
 0xa24   : > { %v2985_v29 = vpop.permute.xlu0 %2984 }
 0xa26   : > { %4679 = vmatmul.mubr.msk.f32.gmra.mrb[40].mxu1 %vm1308_vm8, %v2561_v41 }
 0xa41   : > { %v2552_v42 = vpop.xlane.xlu1 %2551 }
 0xa42   : > { %5164 = vrcp.f32 %v2552_v42 }
 0xa45   : > { %v2668_v46 = vpop.permute.xlu1 %2667 }
 0xa46   : > { %4686 = vmatpush3.msra.mxu0 %v2668_v46 }
 0xa47   : > { %4688 = vmatmul.mubr.msk.f32.vlgmr.msra.gmra.mrb[36].mxu0 %vm1308_vm8, %v2562_v45  ;;  %4898 = vmatprep.subr.bf16.mxu0 %v5229_v59 }
 0xa48   : > { %4690 = vmatprep.mubr.msk.f32.mxu0 %vm5231_vm4, %v5232_v5 }
 0xa49   : > { %v5069_v54 = vpop.permute.xlu1 %5068 }
 0xa4a   : > { %v5071_v60 = vunpack.i.h.bf16 %v5069_v54  ;;  %v5070_v61 = vunpack.i.l.bf16 %v5069_v54 }
 0xa4b   : > { %4691 = vmatmul.mubr.msk.f32.gmra.mrb[38].mxu0 %vm1308_vm8, %v2563_v51 }
 0xa4c   : > { %v5165_v48 = vpop.eup %5164  ;;  %4693 = vmatprep.mubr.msk.f32.mxu0 %vm5231_vm4, %v5232_v5  ;;  %v4903_v14 = vpack.c.bf16 %v5071_v60, %v5070_v61 }
 0xa4d   : > { %4901 = vmatpush3.bf16.xpose.msk.msra.mxu0 %vm5563_vm6, %v4899_v52  ;;  %v2564_v55 = vmul.f32 %v5165_v48, %v5895_v32  ;;  %v2881_v57 = vpop.permute.xlu1 %2880 }
 0xa4e   : > { %4711 = vmatprep.subr.mxu0 %v5232_v5 }
 0xa4f   : > { %4694 = vmatmul.mubr.msk.f32.gmra.mrb[40].mxu0 %vm1308_vm8, %v2564_v55 }
 0xa50   : > { %4713 = vmatprep.mubr.msk.f32.mxu0 %vm5231_vm4, %v5232_v5 }
 0xa51   : > { %v2883_v58 = vpop.permute.xlu1 %2882 }
 0xa55   : > { %4712 = vmatpush3.xpose.msk.msra.mxu0 %vm1102_vm5, %v2891_v53  ;;  %v2885_v56 = vpop.permute.xlu1 %2884 }
 0xa56   : > { %4906 = vmatprep.subr.bf16.mxu0 %v5229_v59 }
 0xa58   : > { %4714 = vmatmul.mubr.msk.f32.vlgmr.msra.gmra.mrb[42].mxu0 %vm1102_vm5, %v2881_v57 }
 0xa59   : > { %4716 = vmatprep.mubr.msk.f32.mxu0 %vm5231_vm4, %v5232_v5  ;;  %v2989_v63 = vpop.permute.xlu1 %2988 }
 0xa5c   : > { %4717 = vmatmul.mubr.msk.f32.gmra.mrb[44].mxu0 %vm1102_vm5, %v2883_v58 }
 0xa5d   : > { %4719 = vmatprep.mubr.msk.f32.mxu0 %vm5231_vm4, %v5232_v5 }
 0xa60   : > { %4720 = vmatmul.mubr.msk.f32.gmra.mrb[46].mxu0 %vm1102_vm5, %v2885_v56 }
 0xa61   : > { %4743 = vmatprep.mubr.msk.f32.mxu0 %vm5231_vm4, %v5232_v5 }
 0xaf1   : > { %v2649_v3 = vpop.f32.mrb[36].mxu1 }
 0xaf2   : > { %v4674_v12 = vpop.f32.mrb[37].mxu1  ;;  %4698 = vmatprep.mubr.msk.f32.mxu1 %vm1102_vm5, %v2649_v3 }
 0xaf5   : > { %v2654_v16 = vpop.f32.mrb[38].mxu1 }
 0xaf6   : > { %v4677_v17 = vpop.f32.mrb[39].mxu1  ;;  %4699 = vmatmul.mubr.msk.f32.vlgmr.msra.gmra.mrb[30].mxu1 %vm1102_vm5, %v2654_v16 }
 0xaf7   : > { %4905 = vmatpush3.bf16.xpose.msk.msra.mxu1 %vm5563_vm6, %v4903_v14 }
 0xaf8   : > { %4726 = vmatprep.subr.mxu1 %v5232_v5 }
 0xaf9   : > { %v2659_v18 = vpop.f32.mrb[40].mxu1 }
 0xafa   : > { %v4680_v19 = vpop.f32.mrb[41].mxu1  ;;  %4701 = vmatprep.mubr.msk.f32.mxu1 %vm1102_vm5, %v2659_v18 }
 0xaff   : > { %4727 = vmatpush3.xpose.msk.msra.mxu1 %vm1102_vm5, %v2995_v21 }
 0xb00   : > { %4909 = vmatprep.subr.bf16.mxu1 %v5229_v59  ;;  %v2987_v59 = vpop.permute.xlu0 %2986 }
 0xb1a   : > { %v2747_v22 = vpop.f32.mrb[36].mxu0 }
 0xb1b   : > { %v4689_v23 = vpop.f32.mrb[37].mxu0  ;;  %4702 = vmatmul.mubr.msk.f32.gmra.mrb[32].mxu1 %vm1102_vm5, %v2747_v22 }
 0xb1e   : > { %v2752_v24 = vpop.f32.mrb[38].mxu0 }
 0xb1f   : > { %v4692_v25 = vpop.f32.mrb[39].mxu0  ;;  %4704 = vmatprep.mubr.msk.f32.mxu1 %vm1102_vm5, %v2752_v24 }
 0xb22   : > { %v2757_v15 = vpop.f32.mrb[40].mxu0 }
 0xb23   : > { %v4695_v28 = vpop.f32.mrb[41].mxu0  ;;  %4705 = vmatmul.mubr.msk.f32.gmra.mrb[34].mxu1 %vm1102_vm5, %v2757_v15 }
 0xb24   : > { %4728 = vmatprep.mubr.msk.f32.mxu1 %vm5231_vm4, %v5232_v5 }
 0xb27   : > { %4729 = vmatmul.mubr.msk.f32.vlgmr.msra.gmra.mrb[42].mxu1 %vm1102_vm5, %v2985_v29 }
 0xb28   : > { %4731 = vmatprep.mubr.msk.f32.mxu1 %vm5231_vm4, %v5232_v5 }
 0xb2b   : > { %v2970_v32 = vpop.f32.mrb[42].mxu0  ;;  %4732 = vmatmul.mubr.msk.f32.gmra.mrb[44].mxu1 %vm1102_vm5, %v2987_v59 }
 0xb2c   : > { %v3088_v8 = vmul.f32 0.35355338, %v2970_v32  ;;  %v4715_v9 = vpop.f32.mrb[43].mxu0  ;;  %4734 = vmatprep.mubr.msk.f32.mxu1 %vm5231_vm4, %v5232_v5 }
 0xb2e   : > { %v3094_v7 = vsel %vm1088_vm7, %v3088_v8, -1e+30 }
 0xb2f   : > { %v2975_v20 = vpop.f32.mrb[44].mxu0  ;;  %4735 = vmatmul.mubr.msk.f32.gmra.mrb[46].mxu1 %vm1102_vm5, %v2989_v63  ;;  %v3100_v1 = vsel %vm1308_vm8, %v3094_v7, -inf }
 0xb30   : > { %v3089_v6 = vmul.f32 0.35355338, %v2975_v20  ;;  %3101 = vmax.xlane.f32.xlu0 %v3100_v1  ;;  %v4718_v13 = vpop.f32.mrb[45].mxu0  ;;  %4758 = vmatprep.mubr.msk.f32.mxu1 %vm5231_vm4, %v5232_v5 }
 0xb32   : > { %v3095_v27 = vsel %vm1088_vm7, %v3089_v6, -1e+30 }
 0xb33   : > { %v2980_v35 = vpop.f32.mrb[46].mxu0  ;;  %v3103_v62 = vsel %vm1308_vm8, %v3095_v27, -inf }
 0xb34   : > { %v3090_v0 = vmul.f32 0.35355338, %v2980_v35  ;;  %3104 = vmax.xlane.f32.xlu1 %v3103_v62  ;;  %v4721_v38 = vpop.f32.mrb[47].mxu0 }
 0xb36   : > { %v3096_v33 = vsel %vm1088_vm7, %v3090_v0, -1e+30 }
 0xb37   : > { %v3106_v26 = vsel %vm1308_vm8, %v3096_v33, -inf }
 0xb38   : > { %3107 = vmax.xlane.f32.xlu0 %v3106_v26 }
 0xbbd   : > { %v3102_v31 = vpop.xlane.xlu0 %3101 }
 0xbbe   : > { %v3118_v34 = vsub.f32 %v3094_v7, %v3102_v31 }
 0xbc0   : > { %v3124_v37 = vmul.f32 1.442695, %v3118_v34 }
 0xbc1   : > { %v3105_v36 = vpop.xlane.xlu1 %3104 }
 0xbc2   : > { %v3119_v39 = vsub.f32 %v3095_v27, %v3105_v36  ;;  %5166 = vpow2.f32 %v3124_v37 }
 0xbc4   : > { %v3126_v41 = vmul.f32 1.442695, %v3119_v39 }
 0xbc5   : > { %v3108_v40 = vpop.xlane.xlu0 %3107 }
 0xbc6   : > { %v3120_v42 = vsub.f32 %v3096_v33, %v3108_v40  ;;  %5168 = vpow2.f32 %v3126_v41 }
 0xbc8   : > { %v3128_v46 = vmul.f32 1.442695, %v3120_v42 }
 0xbca   : > { %5170 = vpow2.f32 %v3128_v46 }
 0xbcc   : > { %v6005_v57 = vpop.eup %5166 }
 0xbcd   : > { %v3136_v60 = vsel %vm1308_vm8, %v6005_v57, 0.0 }
 0xbd0   : > { %v6012_v3 = vpop.eup %5168 }
 0xbd1   : > { %v3139_v12 = vsel %vm1308_vm8, %v6012_v3, 0.0 }
 0xbd4   : > { %v6016_v14 = vpop.eup %5170 }
 0xbd5   : > { %v3142_v16 = vsel %vm1308_vm8, %v6016_v14, 0.0 }
 0xbfa   : > { %v3074_v43 = vpop.f32.mrb[42].mxu1 }
 0xbfb   : > { %v3091_v44 = vmul.f32 0.35355338, %v3074_v43  ;;  %v4730_v45 = vpop.f32.mrb[43].mxu1 }
 0xbfc   : > { %v1092_v45 = vld [vmem:[%s6361_s17 + $0x18] sm:$0xff]  ;;  %s6363_s17 = scalar_lea.vmem %s6327_s14, %s5348_s26 }
 0xbfd   : > { %v3097_v47 = vsel %vm1088_vm7, %v3091_v44, -1e+30 }
 0xbfe   : > { %v3079_v49 = vpop.f32.mrb[44].mxu1  ;;  %v3109_v50 = vsel %vm1308_vm8, %v3097_v47, -inf }
 0xbff   : > { %v3092_v51 = vmul.f32 0.35355338, %v3079_v49  ;;  %3110 = vmax.xlane.f32.xlu0 %v3109_v50  ;;  %v4733_v52 = vpop.f32.mrb[45].mxu1 }
 0xc01   : > { %v3098_v48 = vsel %vm1088_vm7, %v3092_v51, -1e+30 }
 0xc02   : > { %v3084_v54 = vpop.f32.mrb[46].mxu1  ;;  %v3112_v55 = vsel %vm1308_vm8, %v3098_v48, -inf }
 0xc03   : > { %v3093_v53 = vmul.f32 0.35355338, %v3084_v54  ;;  %3113 = vmax.xlane.f32.xlu0 %v3112_v55  ;;  %v4736_v58 = vpop.f32.mrb[47].mxu1 }
 0xc04   : > { %v4262_v58 = vld [vmem:[%s6362_s20] ss:$0 sm:$0xff] }
 0xc05   : > { %v3099_v56 = vsel %vm1088_vm7, %v3093_v53, -1e+30 }
 0xc06   : > { %v3115_v61 = vsel %vm1308_vm8, %v3099_v56, -inf }
 0xc07   : > { %3137 = vadd.xlane.f32.xlu0 %v3136_v60  ;;  %3116 = vmax.xlane.f32.xlu1 %v3115_v61 }
 0xc0b   : > { %3140 = vadd.xlane.f32.xlu1 %v3139_v12  ;;  %v5214_v12 = vld [vmem:[#allocation2 + $0x8] sm:$0xff] }
 0xc0f   : > { %3143 = vadd.xlane.f32.xlu1 %v3142_v16  ;;  %v5215_v16 = vld [vmem:[#allocation2] sm:$0xff] }
 0xc20   : > { %5078 = vrot.lane.b32.xlu1 %v5555_v10, %s5242_s27 }
 0xc24   : > { %3170 = vrot.lane.b32.xlu1 %v5541_v4, %s5242_s27 }
 0xc8c   : > { %v3111_v30 = vpop.xlane.xlu0 %3110 }
 0xc8d   : > { %v3121_v17 = vsub.f32 %v3097_v47, %v3111_v30 }
 0xc8f   : > { %v3130_v18 = vmul.f32 1.442695, %v3121_v17 }
 0xc90   : > { %v3114_v19 = vpop.xlane.xlu0 %3113 }
 0xc91   : > { %5172 = vpow2.f32 %v3130_v18  ;;  %v3122_v21 = vsub.f32 %v3098_v48, %v3114_v19 }
 0xc93   : > { %v3132_v22 = vmul.f32 1.442695, %v3122_v21 }
 0xc94   : > { %v3117_v23 = vpop.xlane.xlu1 %3116  ;;  %v3138_v1 = vpop.xlane.xlu0 %3137 }
 0xc95   : > { %5174 = vpow2.f32 %v3132_v22  ;;  %v3123_v24 = vsub.f32 %v3099_v56, %v3117_v23 }
 0xc97   : > { %v3134_v25 = vmul.f32 1.442695, %v3123_v24  ;;  %v5216_v24 = vld [vmem:[#allocation2 + $0x18] sm:$0xff] }
 0xc98   : > { %v3141_v15 = vpop.xlane.xlu1 %3140 }
 0xc99   : > { %5176 = vpow2.f32 %v3134_v25 }
 0xc9b   : > { %v5173_v28 = vpop.eup %5172 }
 0xc9c   : > { %v3144_v29 = vpop.xlane.xlu1 %3143  ;;  %v3145_v10 = vsel %vm1308_vm8, %v5173_v28, 0.0 }
 0xc9d   : > { %3146 = vadd.xlane.f32.xlu0 %v3145_v10 }
 0xc9f   : > { %v5175_v59 = vpop.eup %5174 }
 0xca0   : > { %v5079_v4 = vpop.permute.xlu1 %5078  ;;  %v3148_v32 = vsel %vm1308_vm8, %v5175_v59, 0.0 }
 0xca1   : > { %v5081_v8 = vunpack.i.h.bf16 %v5079_v4  ;;  %v5080_v9 = vunpack.i.l.bf16 %v5079_v4  ;;  %3149 = vadd.xlane.f32.xlu0 %v3148_v32 }
 0xca3   : > { %v5177_v63 = vpop.eup %5176  ;;  %v4910_v7 = vpack.c.bf16 %v5081_v8, %v5080_v9  ;;  %v5218_v8 = vld [vmem:[#allocation2 + $0x28] sm:$0xff] }
 0xca4   : > { %v3151_v20 = vsel %vm1308_vm8, %v5177_v63, 0.0  ;;  %v3171_v13 = vpop.permute.xlu1 %3170 }
 0xca5   : > { %3152 = vadd.xlane.f32.xlu1 %v3151_v20  ;;  %4911 = vmatpush3.bf16.msra.mxu1 %v4910_v7 }
 0xca6   : > { %4756 = vmatprep.subr.mxu1 %v5232_v5 }
 0xcb6   : > { %3268 = vrot.lane.b32.xlu1 %v5558_v11, %s5242_s27 }
 0xcb7   : > { %5073 = vrot.lane.b32.xlu0 %v5539_v2, %s5242_s27 }
 0xd2a   : > { %v3147_v6 = vpop.xlane.xlu0 %3146 }
 0xd2b   : > { %5178 = vrcp.f32 %v3147_v6 }
 0xd2c   : > { %5180 = vrcp.f32 %v3138_v1 }
 0xd2e   : > { %v3150_v27 = vpop.xlane.xlu0 %3149 }
 0xd2f   : > { %5182 = vrcp.f32 %v3150_v27 }
 0xd30   : > { %5184 = vrcp.f32 %v3141_v15 }
 0xd32   : > { %v5074_v35 = vpop.permute.xlu0 %5073  ;;  %v3153_v62 = vpop.xlane.xlu1 %3152 }
 0xd33   : > { %v5076_v0 = vunpack.i.h.bf16 %v5074_v35  ;;  %v5075_v38 = vunpack.i.l.bf16 %v5074_v35  ;;  %5186 = vrcp.f32 %v3153_v62 }
 0xd34   : > { %5188 = vrcp.f32 %v3144_v29 }
 0xd35   : > { %v5179_v33 = vpop.eup %5178  ;;  %v4907_v26 = vpack.c.bf16 %v5076_v0, %v5075_v38 }
 0xd36   : > { %v3163_v11 = vmul.f32 %v5179_v33, %v5173_v28  ;;  %v3269_v31 = vpop.permute.xlu1 %3268  ;;  %v5181_v34 = vpop.eup %5180  ;;  %v5217_v28 = vld [vmem:[#allocation2 + $0x10] sm:$0xff] }
 0xd37   : > { %4908 = vmatpush3.bf16.msra.mxu0 %v4907_v26  ;;  %4757 = vmatpush3.msra.mxu1 %v3269_v31  ;;  %v3160_v36 = vmul.f32 %v5181_v34, %v6005_v57 }
 0xd38   : > { %4759 = vmatmul.mubr.msk.f32.vlgmr.msra.gmra.mrb[48].mxu1 %vm1308_vm8, %v3163_v11  ;;  %4741 = vmatprep.subr.mxu0 %v5232_v5 }
 0xd39   : > { %v5183_v2 = vpop.eup %5182  ;;  %4761 = vmatprep.mubr.msk.f32.mxu1 %vm5231_vm4, %v5232_v5  ;;  %4767 = vmatprep.subr.mxu1 %v1092_v45 }
 0xd3a   : > { %v3164_v37 = vmul.f32 %v5183_v2, %v5175_v59  ;;  %v5185_v39 = vpop.eup %5184  ;;  %4768 = vmatpush3.msra.mxu1 %v1092_v45 }
 0xd3b   : > { %4742 = vmatpush3.msra.mxu0 %v3171_v13  ;;  %v3161_v41 = vmul.f32 %v5185_v39, %v6012_v3 }
 0xd3c   : > { %4744 = vmatmul.mubr.msk.f32.vlgmr.msra.gmra.mrb[48].mxu0 %vm1308_vm8, %v3160_v36  ;;  %4762 = vmatmul.mubr.msk.f32.gmra.mrb[50].mxu1 %vm1308_vm8, %v3164_v37 }
 0xd3d   : > { %v5187_v40 = vpop.eup %5186  ;;  %4746 = vmatprep.mubr.msk.f32.mxu0 %vm5231_vm4, %v5232_v5  ;;  %4764 = vmatprep.mubr.msk.f32.mxu1 %vm5231_vm4, %v5232_v5 }
 0xd3e   : > { %v3165_v42 = vmul.f32 %v5187_v40, %v5177_v63  ;;  %v5189_v43 = vpop.eup %5188  ;;  %v5219_v63 = vld [vmem:[#allocation2 + $0x20] sm:$0xff] }
 0xd3f   : > { %v3162_v44 = vmul.f32 %v5189_v43, %v6016_v14 }
 0xd40   : > { %4747 = vmatmul.mubr.msk.f32.gmra.mrb[50].mxu0 %vm1308_vm8, %v3161_v41  ;;  %4765 = vmatmul.mubr.msk.f32.gmra.mrb[52].mxu1 %vm1308_vm8, %v3165_v42 }
 0xd41   : > { %4749 = vmatprep.mubr.msk.f32.mxu0 %vm5231_vm4, %v5232_v5 }
 0xd44   : > { %4750 = vmatmul.mubr.msk.f32.gmra.mrb[52].mxu0 %vm1308_vm8, %v3162_v44 }
 0xe0b   : > { %v3348_v46 = vpop.f32.mrb[48].mxu1 }
 0xe0c   : > { %v4760_v47 = vpop.f32.mrb[49].mxu1 }
 0xe0f   : > { %v3250_v49 = vpop.f32.mrb[48].mxu0  ;;  %v3353_v50 = vpop.f32.mrb[50].mxu1 }
 0xe10   : > { %v4745_v51 = vpop.f32.mrb[49].mxu0  ;;  %v4763_v52 = vpop.f32.mrb[51].mxu1  ;;  %4769 = vmatprep.mubr.msk.f32.mxu1 %vm1102_vm5, %v3250_v49 }
 0xe13   : > { %v3255_v48 = vpop.f32.mrb[50].mxu0  ;;  %v3358_v54 = vpop.f32.mrb[52].mxu1 }
 0xe14   : > { %v4748_v55 = vpop.f32.mrb[51].mxu0  ;;  %v4766_v5 = vpop.f32.mrb[53].mxu1  ;;  %4770 = vmatmul.mubr.msk.f32.vlgmr.msra.gmra.mrb[30].mxu1 %vm1102_vm5, %v3255_v48 }
 0xe15   : > { %v3604_v5 = vld [vmem:[%s5388_s7] sm:$0xff] }
 0xe17   : > { %v3260_v57 = vpop.f32.mrb[52].mxu0 }
 0xe18   : > { %v4751_v53 = vpop.f32.mrb[53].mxu0  ;;  %4772 = vmatprep.mubr.msk.f32.mxu1 %vm1102_vm5, %v3260_v57  ;;  %v3605_v57 = vld [vmem:[%s5388_s7 + $0x8] sm:$0xff] }
 0xe19   : > { %4773 = vmatmul.mubr.msk.f32.gmra.mrb[32].mxu1 %vm1102_vm5, %v3348_v46  ;;  %v4912_v53 = vpack.c.bf16 %v3605_v57, %v3604_v5 }
 0xe1a   : > { %4775 = vmatprep.mubr.msk.f32.mxu1 %vm1102_vm5, %v3353_v50 }
 0xe1b   : > { %4913 = vmatprep.subr.bf16.mxu0 %v4912_v53 }
 0xe1c   : > { %4915 = vmatpush3.bf16.msra.mxu0 %v4912_v53  ;;  %v3765_v53 = vld [vmem:[%s5398_s0 + $0x38] sm:$0xff] }
 0xe1d   : > { %4776 = vmatmul.mubr.msk.f32.gmra.mrb[34].mxu1 %vm1102_vm5, %v3358_v54 }
 0xee7   : > { %v4771_v56 = vpop.f32.mrb[30].mxu1 }
 0xee8   : > { %v3489_v60 = vadd.f32 %v4771_v56, %v4262_v58  ;;  %v3446_v61 = vpop.f32.mrb[31].mxu1  ;;  %v3607_v56 = vld [vmem:[%s5388_s7 + $0x18] sm:$0xff] }
 0xee9   : > { %v3488_v3 = vadd.f32 %v4262_v58, %v3446_v61  ;;  %v3758_v61 = vld [vmem:[%s5398_s0] sm:$0xff] }
 0xeea   : > { %v6062_v14 = vadd.f32 %v5214_v12, %v3489_v60 }
 0xeeb   : > { %v6064_v30 = vadd.f32 %v5215_v16, %v3488_v3  ;;  %v3759_v3 = vld [vmem:[%s5398_s0 + $0x8] sm:$0xff] }
 0xeec   : > { %v4774_v17 = vpop.f32.mrb[32].mxu1  ;;  %v3505_v18 = vsel %vm858_vm3, %v6062_v14, 0.0  ;;  %v4920_v12 = vpack.c.bf16 %v3759_v3, %v3758_v61  ;;  %v3768_v3 = vld [vmem:[%s5398_s0 + $0x50] sm:$0xff] }
 0xeed   : > { %v3491_v19 = vadd.f32 %v4774_v17, %v4262_v58  ;;  %3506 = vadd.xlane.f32.xlu1 %v3505_v18  ;;  %v3456_v21 = vpop.f32.mrb[33].mxu1  ;;  %v3502_v22 = vsel %vm858_vm3, %v6064_v30, 0.0 }
 0xeee   : > { %v3490_v23 = vadd.f32 %v4262_v58, %v3456_v21  ;;  %3503 = vadd.xlane.f32.xlu0 %v3502_v22 }
 0xeef   : > { %v6070_v25 = vadd.f32 %v5216_v24, %v3491_v19 }
 0xef0   : > { %v4777_v15 = vpop.f32.mrb[34].mxu1  ;;  %v6072_v29 = vadd.f32 %v5217_v28, %v3490_v23 }
 0xef1   : > { %v3493_v10 = vadd.f32 %v4777_v15, %v4262_v58  ;;  %v3466_v59 = vpop.f32.mrb[35].mxu1  ;;  %v3511_v4 = vsel %vm858_vm3, %v6070_v25, 0.0 }
 0xef2   : > { %v3492_v32 = vadd.f32 %v4262_v58, %v3466_v59  ;;  %3512 = vadd.xlane.f32.xlu0 %v3511_v4  ;;  %v3508_v20 = vsel %vm858_vm3, %v6072_v29, 0.0  ;;  %v3606_v58 = vld [vmem:[%s5388_s7 + $0x10] sm:$0xff] }
 0xef3   : > { %v6076_v9 = vadd.f32 %v5218_v8, %v3493_v10  ;;  %v4916_v60 = vpack.c.bf16 %v3607_v56, %v3606_v58  ;;  %v3766_v56 = vld [vmem:[%s5398_s0 + $0x40] sm:$0xff] }
 0xef4   : > { %v6078_v7 = vadd.f32 %v5219_v63, %v3492_v32 }
 0xef5   : > { %v3517_v1 = vsel %vm858_vm3, %v6076_v9, 0.0  ;;  %4917 = vmatprep.subr.bf16.mxu0 %v4916_v60 }
 0xef6   : > { %3509 = vadd.xlane.f32.xlu0 %v3508_v20  ;;  %3518 = vadd.xlane.f32.xlu1 %v3517_v1  ;;  %v3514_v6 = vsel %vm858_vm3, %v6078_v7, 0.0 }
 0xef7   : > { %4919 = vmatpush3.bf16.msra.mxu0 %v4916_v60  ;;  %v3767_v60 = vld [vmem:[%s5398_s0 + $0x48] sm:$0xff] }
 0xef8   : > { %4921 = vmatprep.subr.bf16.mxu0 %v4920_v12  ;;  %v4936_v61 = vpack.c.bf16 %v3767_v60, %v3766_v56 }
 0xefa   : > { %3515 = vadd.xlane.f32.xlu0 %v3514_v6  ;;  %v4263_v6 = vld [vmem:[%s686_s6] ss:$0 sm:$0xff] }
 0xf7a   : > { %v3507_v13 = vpop.xlane.xlu1 %3506 }
 0xf7b   : > { %v3521_v27 = vmul.f32 0.03125, %v3507_v13  ;;  %v3504_v35 = vpop.xlane.xlu0 %3503 }
 0xf7c   : > { %v3520_v62 = vmul.f32 0.03125, %v3504_v35 }
 0xf7d   : > { %v6087_v0 = vsub.f32 %v6062_v14, %v3521_v27 }
 0xf7e   : > { %v6090_v38 = vsub.f32 %v6064_v30, %v3520_v62 }
 0xf7f   : > { %v3513_v33 = vpop.xlane.xlu0 %3512  ;;  %v3533_v26 = vmul.f32 %v6087_v0, %v6087_v0 }
 0xf80   : > { %v3523_v11 = vmul.f32 0.03125, %v3513_v33  ;;  %v3532_v31 = vmul.f32 %v6090_v38, %v6090_v38  ;;  %v4264_v33 = vld [vmem:[%s689_s21] ss:$0 sm:$0xff] }
 0xf81   : > { %v3541_v34 = vsel %vm858_vm3, %v3533_v26, 0.0 }
 0xf82   : > { %v6098_v2 = vsub.f32 %v6070_v25, %v3523_v11  ;;  %3542 = vadd.xlane.f32.xlu1 %v3541_v34  ;;  %v3538_v36 = vsel %vm858_vm3, %v3532_v31, 0.0  ;;  %v3760_v31 = vld [vmem:[%s5398_s0 + $0x10] sm:$0xff]  ;;  %v3761_v34 = vld [vmem:[%s5398_s0 + $0x18] sm:$0xff] }
 0xf83   : > { %v3510_v37 = vpop.xlane.xlu0 %3509  ;;  %v3519_v39 = vpop.xlane.xlu1 %3518  ;;  %3539 = vadd.xlane.f32.xlu0 %v3538_v36 }
 0xf84   : > { %v3522_v40 = vmul.f32 0.03125, %v3510_v37  ;;  %v3525_v41 = vmul.f32 0.03125, %v3519_v39  ;;  %v3535_v42 = vmul.f32 %v6098_v2, %v6098_v2 }
 0xf86   : > { %v6104_v43 = vsub.f32 %v6072_v29, %v3522_v40  ;;  %v6107_v44 = vsub.f32 %v6076_v9, %v3525_v41  ;;  %v3547_v45 = vsel %vm858_vm3, %v3535_v42, 0.0  ;;  %v4924_v40 = vpack.c.bf16 %v3761_v34, %v3760_v31  ;;  %v3762_v41 = vld [vmem:[%s5398_s0 + $0x20] sm:$0xff] }
 0xf87   : > { %3548 = vadd.xlane.f32.xlu1 %v3547_v45  ;;  %v3516_v46 = vpop.xlane.xlu0 %3515 }
 0xf88   : > { %v3524_v47 = vmul.f32 0.03125, %v3516_v46  ;;  %v3537_v49 = vmul.f32 %v6107_v44, %v6107_v44  ;;  %v3534_v50 = vmul.f32 %v6104_v43, %v6104_v43 }
 0xf8a   : > { %v6115_v51 = vsub.f32 %v6078_v7, %v3524_v47  ;;  %v3553_v52 = vsel %vm858_vm3, %v3537_v49, 0.0  ;;  %v3544_v48 = vsel %vm858_vm3, %v3534_v50, 0.0 }
 0xf8b   : > { %3554 = vadd.xlane.f32.xlu1 %v3553_v52  ;;  %3545 = vadd.xlane.f32.xlu0 %v3544_v48 }
 0xf8c   : > { %v3536_v54 = vmul.f32 %v6115_v51, %v6115_v51 }
 0xf8e   : > { %v3550_v55 = vsel %vm858_vm3, %v3536_v54, 0.0 }
 0xf8f   : > { %3551 = vadd.xlane.f32.xlu0 %v3550_v55 }
0x100f   : > { %v3543_v16 = vpop.xlane.xlu1 %3542 }
0x1010   : > { %v3557_v17 = vmul.f32 0.03125, %v3543_v16  ;;  %v3540_v18 = vpop.xlane.xlu0 %3539 }
0x1011   : > { %v3556_v19 = vmul.f32 0.03125, %v3540_v18  ;;  %v3771_v18 = vld [vmem:[%s5398_s0 + $0x68] sm:$0xff] }
0x1012   : > { %v3563_v21 = vadd.f32 1e-05, %v3557_v17  ;;  %v3770_v17 = vld [vmem:[%s5398_s0 + $0x60] sm:$0xff] }
0x1013   : > { %v3562_v22 = vadd.f32 1e-05, %v3556_v19  ;;  %v4944_v19 = vpack.c.bf16 %v3771_v18, %v3770_v17 }
0x1014   : > { %5190 = vrsqrt.f32 %v3563_v21  ;;  %v3549_v23 = vpop.xlane.xlu1 %3548  ;;  %v3772_v21 = vld [vmem:[%s5398_s0 + $0x70] sm:$0xff] }
0x1015   : > { %5192 = vrsqrt.f32 %v3562_v22  ;;  %v3559_v24 = vmul.f32 0.03125, %v3549_v23  ;;  %v3773_v22 = vld [vmem:[%s5398_s0 + $0x78] sm:$0xff] }
0x1016   : > { %v4948_v23 = vpack.c.bf16 %v3773_v22, %v3772_v21 }
0x1017   : > { %v3565_v15 = vadd.f32 1e-05, %v3559_v24  ;;  %v4265_v24 = vld [vmem:[%s6363_s17] ss:$0 sm:$0xff] }
0x1018   : > { %v3555_v28 = vpop.xlane.xlu1 %3554  ;;  %v3546_v10 = vpop.xlane.xlu0 %3545 }
0x1019   : > { %5194 = vrsqrt.f32 %v3565_v15  ;;  %v3561_v59 = vmul.f32 0.03125, %v3555_v28  ;;  %v3558_v4 = vmul.f32 0.03125, %v3546_v10 }
0x101b   : > { %v3567_v32 = vadd.f32 1e-05, %v3561_v59  ;;  %v3564_v8 = vadd.f32 1e-05, %v3558_v4 }
0x101c   : > { %v3552_v63 = vpop.xlane.xlu0 %3551 }
0x101d   : > { %5196 = vrsqrt.f32 %v3567_v32  ;;  %v3560_v20 = vmul.f32 0.03125, %v3552_v63 }
0x101e   : > { %v5191_v1 = vpop.eup %5190  ;;  %5198 = vrsqrt.f32 %v3564_v8 }
0x101f   : > { %v5193_v13 = vpop.eup %5192  ;;  %v3575_v27 = vmul.f32 %v5191_v1, %v6087_v0  ;;  %v3566_v35 = vadd.f32 1e-05, %v3560_v20 }
0x1020   : > { %v3574_v62 = vmul.f32 %v5193_v13, %v6090_v38  ;;  %v3763_v38 = vld [vmem:[%s5398_s0 + $0x28] sm:$0xff] }
0x1021   : > { %v3587_v26 = vmul.f32 %v4263_v6, %v3575_v27  ;;  %5200 = vrsqrt.f32 %v3566_v35  ;;  %v4928_v47 = vpack.c.bf16 %v3763_v38, %v3762_v41 }
0x1022   : > { %v3586_v11 = vmul.f32 %v4263_v6, %v3574_v62 }
0x1023   : > { %v5195_v36 = vpop.eup %5194  ;;  %v3599_v39 = vadd.f32 %v4264_v33, %v3587_v26 }
0x1024   : > { %v3598_v37 = vadd.f32 %v4264_v33, %v3586_v11  ;;  %v3577_v0 = vmul.f32 %v5195_v36, %v6098_v2 }
0x1026   : > { %4786 = vmatprep.mubr.msk.f32.mxu0 %vm858_vm3, %v3598_v37  ;;  %v3589_v49 = vmul.f32 %v4263_v6, %v3577_v0 }
0x1027   : > { %v5197_v42 = vpop.eup %5196  ;;  %4787 = vmatmul.mubr.msk.f32.vlgmr.msra.gmra.mrb[54].mxu0 %vm858_vm3, %v3599_v39 }
0x1028   : > { %v5199_v45 = vpop.eup %5198  ;;  %4923 = vmatpush3.bf16.msra.mxu0 %v4920_v12  ;;  %v3579_v50 = vmul.f32 %v5197_v42, %v6107_v44  ;;  %v3601_v55 = vadd.f32 %v4264_v33, %v3589_v49  ;;  %v3769_v12 = vld [vmem:[%s5398_s0 + $0x58] sm:$0xff] }
0x1029   : > { %v3576_v46 = vmul.f32 %v5199_v45, %v6104_v43  ;;  %4925 = vmatprep.subr.bf16.mxu0 %v4924_v40  ;;  %v4940_v16 = vpack.c.bf16 %v3769_v12, %v3768_v3 }
0x102a   : > { %v3591_v57 = vmul.f32 %v4263_v6, %v3579_v50 }
0x102b   : > { %v5201_v52 = vpop.eup %5200  ;;  %v3588_v48 = vmul.f32 %v4263_v6, %v3576_v46 }
0x102c   : > { %v3578_v2 = vmul.f32 %v5201_v52, %v6115_v51  ;;  %4927 = vmatpush3.bf16.msra.mxu0 %v4924_v40  ;;  %v3603_v44 = vadd.f32 %v4264_v33, %v3591_v57  ;;  %v3764_v51 = vld [vmem:[%s5398_s0 + $0x30] sm:$0xff] }
0x102d   : > { %v3600_v54 = vadd.f32 %v4264_v33, %v3588_v48  ;;  %4929 = vmatprep.subr.bf16.mxu0 %v4928_v47  ;;  %v4932_v58 = vpack.c.bf16 %v3765_v53, %v3764_v51  ;;  %v4272_v51 = vld [vmem:[%s705_s1] ss:$0 sm:$0xff] }
0x102e   : > { %v3590_v5 = vmul.f32 %v4263_v6, %v3578_v2 }
0x102f   : > { %4789 = vmatprep.mubr.msk.f32.mxu0 %vm858_vm3, %v3600_v54 }
0x1030   : > { %4790 = vmatmul.mubr.msk.f32.gmra.mrb[56].mxu0 %vm858_vm3, %v3601_v55  ;;  %v3602_v43 = vadd.f32 %v4264_v33, %v3590_v5 }
0x1031   : > { %4931 = vmatpush3.bf16.msra.mxu0 %v4928_v47 }
0x1032   : > { %4792 = vmatprep.mubr.msk.f32.mxu0 %vm858_vm3, %v3602_v43  ;;  %4933 = vmatprep.subr.bf16.mxu0 %v4932_v58 }
0x1034   : > { %4793 = vmatmul.mubr.msk.f32.gmra.mrb[58].mxu0 %vm858_vm3, %v3603_v44 }
0x1035   : > { %4935 = vmatpush3.bf16.msra.mxu0 %v4932_v58 }
0x1036   : > { %4937 = vmatprep.subr.bf16.mxu0 %v4936_v61 }
0x1039   : > { %4939 = vmatpush3.bf16.msra.mxu0 %v4936_v61 }
0x103a   : > { %4941 = vmatprep.subr.bf16.mxu0 %v4940_v16 }
0x103d   : > { %4943 = vmatpush3.bf16.msra.mxu0 %v4940_v16 }
0x103e   : > { %4945 = vmatprep.subr.bf16.mxu0 %v4944_v19 }
0x1041   : > { %4947 = vmatpush3.bf16.msra.mxu0 %v4944_v19 }
0x1042   : > { %4949 = vmatprep.subr.bf16.mxu0 %v4948_v23 }
0x1045   : > { %4951 = vmatpush3.bf16.msra.mxu0 %v4948_v23 }
0x10fa   : > { %v4788_v15 = vpop.f32.mrb[54].mxu0 }
0x10fb   : > { %v3705_v28 = vadd.f32 %v4788_v15, %v4265_v24  ;;  %v3699_v10 = vpop.f32.mrb[55].mxu0 }
0x10fc   : > { %v3700_v59 = vadd.f32 %v4265_v24, %v3699_v10 }
0x10fd   : > { %v3735_v4 = vmul.f32 0.70710677, %v3705_v28  ;;  %v3729_v40 = vmul.f32 0.5, %v3705_v28 }
0x10fe   : > { %v3734_v32 = vmul.f32 0.70710677, %v3700_v59  ;;  %v3728_v36 = vmul.f32 0.5, %v3700_v59 }
0x10ff   : > { %5202 = verf.f32 %v3735_v4 }
0x1100   : > { %5204 = verf.f32 %v3734_v32 }
0x1103   : > { %v4791_v8 = vpop.f32.mrb[56].mxu0 }
0x1104   : > { %v3715_v63 = vadd.f32 %v4791_v8, %v4265_v24  ;;  %v3709_v20 = vpop.f32.mrb[57].mxu0 }
0x1105   : > { %v3710_v1 = vadd.f32 %v4265_v24, %v3709_v20 }
0x1106   : > { %v3737_v6 = vmul.f32 0.70710677, %v3715_v63  ;;  %v3731_v49 = vmul.f32 0.5, %v3715_v63 }
0x1107   : > { %v3736_v13 = vmul.f32 0.70710677, %v3710_v1  ;;  %v4794_v27 = vpop.f32.mrb[58].mxu0  ;;  %v3730_v46 = vmul.f32 0.5, %v3710_v1 }
0x1108   : > { %5206 = verf.f32 %v3737_v6  ;;  %v3725_v35 = vadd.f32 %v4794_v27, %v4265_v24  ;;  %v3719_v62 = vpop.f32.mrb[59].mxu0 }
0x1109   : > { %v5203_v33 = vpop.eup %5202  ;;  %5208 = verf.f32 %v3736_v13  ;;  %v3720_v26 = vadd.f32 %v4265_v24, %v3719_v62 }
0x110a   : > { %v5205_v11 = vpop.eup %5204  ;;  %v3747_v31 = vadd.f32 1.0, %v5203_v33  ;;  %v3739_v34 = vmul.f32 0.70710677, %v3725_v35  ;;  %v3733_v57 = vmul.f32 0.5, %v3725_v35 }
0x110b   : > { %v3746_v37 = vadd.f32 1.0, %v5205_v11  ;;  %v3738_v39 = vmul.f32 0.70710677, %v3720_v26  ;;  %v3732_v55 = vmul.f32 0.5, %v3720_v26 }
0x110c   : > { %5210 = verf.f32 %v3739_v34  ;;  %v3753_v41 = vmul.f32 %v3747_v31, %v3729_v40 }
0x110d   : > { %5212 = verf.f32 %v3738_v39  ;;  %v3752_v0 = vmul.f32 %v3746_v37, %v3728_v36 }
0x110f   : > { %4827 = vmatprep.mubr.f32.mxu0 %v3752_v0 }
0x1110   : > { %4828 = vmatmul.mubr.f32.vlgmr.msra.gmra.mrb[60].mxu0 %v3753_v41 }
0x1112   : > { %v5207_v38 = vpop.eup %5206 }
0x1113   : > { %v5209_v42 = vpop.eup %5208  ;;  %v3749_v45 = vadd.f32 1.0, %v5207_v38 }
0x1114   : > { %v3748_v47 = vadd.f32 1.0, %v5209_v42 }
0x1115   : > { %v3755_v54 = vmul.f32 %v3749_v45, %v3731_v49 }
0x1116   : > { %v5211_v50 = vpop.eup %5210  ;;  %v3754_v52 = vmul.f32 %v3748_v47, %v3730_v46 }
0x1117   : > { %v5213_v48 = vpop.eup %5212  ;;  %v3751_v2 = vadd.f32 1.0, %v5211_v50 }
0x1118   : > { %v3750_v5 = vadd.f32 1.0, %v5213_v48  ;;  %4830 = vmatprep.mubr.f32.mxu0 %v3754_v52 }
0x1119   : > { %4831 = vmatmul.mubr.f32.gmra.mrb[62].mxu0 %v3755_v54  ;;  %v3757_v44 = vmul.f32 %v3751_v2, %v3733_v57 }
0x111a   : > { %v3756_v43 = vmul.f32 %v3750_v5, %v3732_v55 }
0x111c   : > { %4833 = vmatprep.mubr.f32.mxu0 %v3756_v43 }
0x111d   : > { %4834 = vmatmul.mubr.f32.gmra.mrb[64].mxu0 %v3757_v44 }
0x11e3   : > { %v4829_v53 = vpop.f32.mrb[60].mxu0 }
0x11e4   : > { %v3853_v58 = vadd.f32 %v4829_v53, %v4272_v51  ;;  %v3847_v56 = vpop.f32.mrb[61].mxu0 }
0x11e5   : > { %v3848_v60 = vadd.f32 %v4272_v51, %v3847_v56 }
0x11e6   : > { %v6175_v61 = vadd.f32 %v3853_v58, %v6062_v14 }
0x11e7   : > { %v6178_v3 = vadd.f32 %v3848_v60, %v6064_v30 }
0x11e8   : > { %3883 = vst.msk [vmem:[#allocation2 + $0x8] sm:$0xff] %vm858_vm3, %v6175_v61  ;;  %3893 = vst.msk [vmem:[%s6364_s9 + $0x8] sm:$0xff] (!%p4273_p5), %vm858_vm3, %v6175_v61 }
0x11e9   : > { %3882 = vst.msk [vmem:[#allocation2] sm:$0xff] %vm858_vm3, %v6178_v3  ;;  %3892 = vst.msk [vmem:[%s6364_s9] sm:$0xff] (!%p4273_p5), %vm858_vm3, %v6178_v3 }
0x11ec   : > { %v4832_v12 = vpop.f32.mrb[62].mxu0 }
0x11ed   : > { %v3863_v16 = vadd.f32 %v4832_v12, %v4272_v51  ;;  %v3857_v17 = vpop.f32.mrb[63].mxu0 }
0x11ee   : > { %v3858_v18 = vadd.f32 %v4272_v51, %v3857_v17 }
0x11ef   : > { %v6185_v19 = vadd.f32 %v3863_v16, %v6070_v25 }
0x11f0   : > { %v6188_v21 = vadd.f32 %v3858_v18, %v6072_v29  ;;  %v4835_v14 = vpop.f32.mrb[64].mxu0  ;;  %3891 = sbr.rel (%p4273_p5) target bundleno = 4599 (0x11f7), region = 96 }
0x11f1   : > { %3885 = vst.msk [vmem:[#allocation2 + $0x18] sm:$0xff] %vm858_vm3, %v6185_v19  ;;  %v3873_v30 = vadd.f32 %v4835_v14, %v4272_v51  ;;  %v3867_v22 = vpop.f32.mrb[65].mxu0  ;;  %3895 = vst.msk [vmem:[%s6364_s9 + $0x18] sm:$0xff] (!%p4273_p5), %vm858_vm3, %v6185_v19 }
0x11f2   : > { %3884 = vst.msk [vmem:[#allocation2 + $0x10] sm:$0xff] %vm858_vm3, %v6188_v21  ;;  %v3868_v23 = vadd.f32 %v4272_v51, %v3867_v22  ;;  %3894 = vst.msk [vmem:[%s6364_s9 + $0x10] sm:$0xff] (!%p4273_p5), %vm858_vm3, %v6188_v21 }
0x11f3   : > { %v6195_v24 = vadd.f32 %v3873_v30, %v6076_v9 }
0x11f4   : > { %v6198_v15 = vadd.f32 %v3868_v23, %v6078_v7 }
0x11f5   : > { %3887 = vst.msk [vmem:[#allocation2 + $0x28] sm:$0xff] %vm858_vm3, %v6195_v24  ;;  %3897 = vst.msk [vmem:[%s6364_s9 + $0x28] sm:$0xff] (!%p4273_p5), %vm858_vm3, %v6195_v24 }
0x11f6   : > { %3886 = vst.msk [vmem:[#allocation2 + $0x20] sm:$0xff] %vm858_vm3, %v6198_v15  ;;  %3896 = vst.msk [vmem:[%s6364_s9 + $0x20] sm:$0xff] (!%p4273_p5), %vm858_vm3, %v6198_v15 }
0x11f7 PF: > { %p4274_p6 = scmp.ne.s32.totalorder %s5342_s25, 5 }
0x11f8   : > { %s5243_s21 = smov (!%p4274_p6), 32   ;;  %vm3926_vm9 = vcmask (!%p4274_p6), 523520   ;;  %s6365_s5 = sld [smem:[#allocation11_spill]] (!%p4274_p6) }
0x11f9   : > { %3901 = sbr.rel (%p4274_p6) target bundleno = 4725 (0x1275), region = 100  ;;  %3912 = vrot.lane.b32.xlu1 (!%p4274_p6), %v6188_v21, %s5243_s21  ;;  %3908 = vrot.lane.b32.xlu0 (!%p4274_p6), %v6178_v3, %s5243_s21 }
0x11fd   : > { %3914 = vrot.lane.b32.xlu1 (!%p4274_p6), %v6185_v19, %s5243_s21  ;;  %3910 = vrot.lane.b32.xlu0 (!%p4274_p6), %v6175_v61, %s5243_s21 }
0x1201   : > { %3918 = vrot.lane.b32.xlu1 %v6195_v24, %s5243_s21  ;;  %3916 = vrot.lane.b32.xlu0 %v6198_v15, %s5243_s21 }
0x126b   : > { %v3913_v25 = vpop.permute.xlu1 %3912  ;;  %v3909_v29 = vpop.permute.xlu0 %3908 }
0x126c   : > { %3929 = vst.msk [vmem:[%s6365_s5 + $0x10] sm:$0xff] %vm3926_vm9, %v3913_v25  ;;  %3927 = vst.msk [vmem:[%s6365_s5] sm:$0xff] %vm3926_vm9, %v3909_v29 }
0x126f   : > { %v3915_v9 = vpop.permute.xlu1 %3914  ;;  %v3911_v7 = vpop.permute.xlu0 %3910 }
0x1270   : > { %3930 = vst.msk [vmem:[%s6365_s5 + $0x18] sm:$0xff] %vm3926_vm9, %v3915_v9  ;;  %3928 = vst.msk [vmem:[%s6365_s5 + $0x8] sm:$0xff] %vm3926_vm9, %v3911_v7 }
0x1273   : > { %v3919_v28 = vpop.permute.xlu1 %3918  ;;  %v3917_v10 = vpop.permute.xlu0 %3916 }
0x1274   : > { %3932 = vst.msk [vmem:[%s6365_s5 + $0x28] sm:$0xff] %vm3926_vm9, %v3919_v28  ;;  %3931 = vst.msk [vmem:[%s6365_s5 + $0x20] sm:$0xff] %vm3926_vm9, %v3917_v10 }
0x1275 PF: > { %p4275_p7 = scmp.ne.s32.totalorder %s5342_s25, 8 }
0x1276   : > { %s5244_s24 = smov (!%p4275_p7), 64   ;;  %vm3961_vm10 = vcmask (!%p4275_p7), 785920   ;;  %s6366_s21 = sld [smem:[#allocation11_spill]] (!%p4275_p7) }
0x1277   : > { %3936 = sbr.rel (%p4275_p7) target bundleno = 4851 (0x12f3), region = 104  ;;  %3947 = vrot.lane.b32.xlu1 (!%p4275_p7), %v6188_v21, %s5244_s24  ;;  %3943 = vrot.lane.b32.xlu0 (!%p4275_p7), %v6178_v3, %s5244_s24 }
0x127b   : > { %3949 = vrot.lane.b32.xlu1 (!%p4275_p7), %v6185_v19, %s5244_s24  ;;  %3945 = vrot.lane.b32.xlu0 (!%p4275_p7), %v6175_v61, %s5244_s24 }
0x127f   : > { %3953 = vrot.lane.b32.xlu1 %v6195_v24, %s5244_s24  ;;  %3951 = vrot.lane.b32.xlu0 %v6198_v15, %s5244_s24 }
0x12e9   : > { %v3948_v59 = vpop.permute.xlu1 %3947  ;;  %v3944_v4 = vpop.permute.xlu0 %3943 }
0x12ea   : > { %3964 = vst.msk [vmem:[%s6366_s21 + $0x10] sm:$0xff] %vm3961_vm10, %v3948_v59  ;;  %3962 = vst.msk [vmem:[%s6366_s21] sm:$0xff] %vm3961_vm10, %v3944_v4 }
0x12ed   : > { %v3950_v32 = vpop.permute.xlu1 %3949  ;;  %v3946_v8 = vpop.permute.xlu0 %3945 }
0x12ee   : > { %3965 = vst.msk [vmem:[%s6366_s21 + $0x18] sm:$0xff] %vm3961_vm10, %v3950_v32  ;;  %3963 = vst.msk [vmem:[%s6366_s21 + $0x8] sm:$0xff] %vm3961_vm10, %v3946_v8 }
0x12f1   : > { %v3954_v63 = vpop.permute.xlu1 %3953  ;;  %v3952_v20 = vpop.permute.xlu0 %3951 }
0x12f2   : > { %3967 = vst.msk [vmem:[%s6366_s21 + $0x28] sm:$0xff] %vm3961_vm10, %v3954_v63  ;;  %3966 = vst.msk [vmem:[%s6366_s21 + $0x20] sm:$0xff] %vm3961_vm10, %v3952_v20 }
0x12f3 PF: > { %p4276_p8 = scmp.ne.s32.totalorder %s5342_s25, 11 }
0x12f4   : > { %s5245_s20 = smov (!%p4276_p8), 96   ;;  %vm3996_vm11 = vcmask (!%p4276_p8), 1048320   ;;  %s6367_s25 = sld [smem:[#allocation11_spill]] (!%p4276_p8) }
0x12f5   : > { %3971 = sbr.rel (%p4276_p8) target bundleno = 4977 (0x1371), region = 108  ;;  %3982 = vrot.lane.b32.xlu1 (!%p4276_p8), %v6188_v21, %s5245_s20  ;;  %3978 = vrot.lane.b32.xlu0 (!%p4276_p8), %v6178_v3, %s5245_s20 }
0x12f9   : > { %3984 = vrot.lane.b32.xlu1 (!%p4276_p8), %v6185_v19, %s5245_s20  ;;  %3980 = vrot.lane.b32.xlu0 (!%p4276_p8), %v6175_v61, %s5245_s20 }
0x12fd   : > { %3988 = vrot.lane.b32.xlu1 %v6195_v24, %s5245_s20  ;;  %3986 = vrot.lane.b32.xlu0 %v6198_v15, %s5245_s20 }
0x1367   : > { %v3983_v1 = vpop.permute.xlu1 %3982  ;;  %v3979_v6 = vpop.permute.xlu0 %3978 }
0x1368   : > { %3999 = vst.msk [vmem:[%s6367_s25 + $0x10] sm:$0xff] %vm3996_vm11, %v3983_v1  ;;  %3997 = vst.msk [vmem:[%s6367_s25] sm:$0xff] %vm3996_vm11, %v3979_v6 }
0x136b   : > { %v3985_v13 = vpop.permute.xlu1 %3984  ;;  %v3981_v27 = vpop.permute.xlu0 %3980 }
0x136c   : > { %4000 = vst.msk [vmem:[%s6367_s25 + $0x18] sm:$0xff] %vm3996_vm11, %v3985_v13  ;;  %3998 = vst.msk [vmem:[%s6367_s25 + $0x8] sm:$0xff] %vm3996_vm11, %v3981_v27 }
0x136f   : > { %v3989_v35 = vpop.permute.xlu1 %3988  ;;  %v3987_v62 = vpop.permute.xlu0 %3986 }
0x1370   : > { %4002 = vst.msk [vmem:[%s6367_s25 + $0x28] sm:$0xff] %vm3996_vm11, %v3989_v35  ;;  %4001 = vst.msk [vmem:[%s6367_s25 + $0x20] sm:$0xff] %vm3996_vm11, %v3987_v62 }
0x1371 PF: > { %s6368_s29 = sld [smem:[#allocation3_spill]] }
0x1377   : > { %s27_s24 = sadd.s32 1, %s6368_s29  }
0x1378   : > { %p24_p9 = scmp.ge.s32.totalorder %s27_s24, 14  }
0x137a   :  { %26 = sbr.rel (!%p24_p9) target bundleno = 8 (0x8), region = 168 }

</bundles_post_ra>
